<compile_context>
chip_gen: v5e
topology: v5e:2x2
jax: 0.10.0
libtpu: 0.0.40
codegen_flags: <defaults>
</compile_context>

<pallas_src>
import jax
import jax.numpy as jnp
from jax import lax
from jax.experimental import pallas as pl
from jax.experimental.pallas import tpu as pltpu

# ---- model hyper-parameters (small, consistent with the module) -------------
VOCAB = 128      # tokenizer.vocab_size
EMBED = 32       # embed_dim
HIDDEN = 32      # hidden_dim
NUM_LAYERS = 2   # num_layers
BATCH = 2
SEQ = 8
PAD_IDX = 0      # tokenizer.pad_token_id


def attention_lstm_kernel(emb_ref,                       # (S*B, E)   bf16
                          w_ih0_ref, w_hh0_ref, b0_ref,  # (E,4H)(H,4H) bf16, (1,4H) f32
                          w_ih1_ref, w_hh1_ref, b1_ref,  # (H,4H)(H,4H) bf16, (1,4H) f32
                          attn_w_ref, attn_b_ref,        # (H,H) bf16, (1,H) f32
                          fc_w_ref, fc_b_ref,            # (H,V) bf16, (1,V) f32
                          logits_ref,                    # out: (B, V) f32
                          attn_ref,                      # out: (B, S) f32
                          hbuf_ref):                     # scratch: (S*B, H) f32
    B, S = attn_ref.shape
    H = w_hh0_ref.shape[0]
    f32 = jnp.float32
    bf16 = jnp.bfloat16

    def run_layer(x_flat_bf16, w_ih, w_hh, bias):
        # Hoisted input projection: one (S*B, in) x (in, 4H) matmul for all t.
        gates_x = jnp.dot(x_flat_bf16, w_ih,
                          preferred_element_type=f32) + bias        # (S*B, 4H)
        h = jnp.zeros((B, H), f32)
        c = jnp.zeros((B, H), f32)
        hs = []
        for t in range(S):                      # static unroll (S fixed, small)
            gates = gates_x[t * B:(t + 1) * B, :] + jnp.dot(
                h.astype(bf16), w_hh, preferred_element_type=f32)   # (B, 4H)
            # Full-width activations over the whole 4H = 128-lane gate vector,
            # then static H-wide slices (gate order i, f, g, o).
            sig = jax.nn.sigmoid(gates)
            tah = jnp.tanh(gates)
            i = sig[:, 0:H]
            f = sig[:, H:2 * H]
            g = tah[:, 2 * H:3 * H]
            o = sig[:, 3 * H:4 * H]
            c = f * c + i * g
            h = o * jnp.tanh(c)
            hbuf_ref[pl.ds(t * B, B), :] = h    # contiguous row-block store
            hs.append(h)
        return hs

    # --- stacked LSTM (num_layers = 2), one shared (S*B, H) scratch ----------
    run_layer(emb_ref[...], w_ih0_ref[...], w_hh0_ref[...], b0_ref[...])
    x1 = hbuf_ref[...].astype(bf16)             # layer-0 output, loaded once
    hs1 = run_layer(x1, w_ih1_ref[...], w_hh1_ref[...], b1_ref[...])

    lstm_out = hbuf_ref[...]                    # (S*B, H) f32, loaded once
    last = hs1[-1]                              # (B, H)  == lstm_out[:, -1, :]

    # energy = tanh(attn(lstm_out))  -- single (S*B, H) x (H, H) matmul
    energy = jnp.tanh(
        jnp.dot(lstm_out.astype(bf16), attn_w_ref[...],
                preferred_element_type=f32) + attn_b_ref[...])      # (S*B, H)

    # attn_scores[b, t] = <energy[t*B + b, :], last[b, :]>
    scores = [jnp.sum(energy[t * B:(t + 1) * B, :] * last,
                      axis=-1, keepdims=True) for t in range(S)]    # (B,1) each

    # softmax over the sequence dimension (per batch row)
    m = scores[0]
    for t in range(1, S):
        m = jnp.maximum(m, scores[t])
    exps = [jnp.exp(sc - m) for sc in scores]
    denom = exps[0]
    for t in range(1, S):
        denom = denom + exps[t]
    inv = 1.0 / denom
    ws = [e * inv for e in exps]                                    # (B,1) each

    # context[b, :] = sum_t w[b, t] * lstm_out[t*B + b, :]
    context = ws[0] * hs1[0]
    for t in range(1, S):
        context = context + ws[t] * hs1[t]                          # (B, H)

    # lane-dense (B, S) attention-weight output (no wrapper transpose needed)
    lane = lax.broadcasted_iota(jnp.int32, (B, S), 1)
    attn_bs = jnp.zeros((B, S), f32)
    for t in range(S):
        attn_bs = attn_bs + jnp.where(lane == t, ws[t], 0.0)
    attn_ref[...] = attn_bs

    logits_ref[...] = (jnp.dot(context.astype(bf16), fc_w_ref[...],
                               preferred_element_type=f32)
                       + fc_b_ref[...])


# ---- deterministic parameter init (shapes from the module __init__) ---------
def init_params(key):
    ks = jax.random.split(key, 16)
    scale = 0.1

    def u(k, shape):
        return jax.random.uniform(k, shape, jnp.float32, -scale, scale)

    emb = jax.random.normal(ks[0], (VOCAB, EMBED), jnp.float32) * scale
    emb = emb.at[PAD_IDX].set(0.0)  # padding_idx row is zero
    return dict(
        emb=emb,
        w_ih0=u(ks[1], (4 * HIDDEN, EMBED)),
        w_hh0=u(ks[2], (4 * HIDDEN, HIDDEN)),
        b_ih0=u(ks[3], (4 * HIDDEN,)),
        b_hh0=u(ks[4], (4 * HIDDEN,)),
        w_ih1=u(ks[5], (4 * HIDDEN, HIDDEN)),
        w_hh1=u(ks[6], (4 * HIDDEN, HIDDEN)),
        b_ih1=u(ks[7], (4 * HIDDEN,)),
        b_hh1=u(ks[8], (4 * HIDDEN,)),
        attn_w=u(ks[9], (HIDDEN, HIDDEN)),
        attn_b=u(ks[10], (HIDDEN,)),
        fc_w=u(ks[11], (VOCAB, HIDDEN)),
        fc_b=u(ks[12], (VOCAB,)),
    )


@jax.jit
def forward(params, input_ids):
    B, S = input_ids.shape
    bf16 = jnp.bfloat16

    embedded = params['emb'][input_ids]                         # (B, S, E) gather (glue)
    emb_flat = jnp.transpose(embedded, (1, 0, 2)).reshape(S * B, EMBED)  # t-major rows
    emb_flat = emb_flat.astype(bf16)

    kernel_args = (
        emb_flat,
        params['w_ih0'].T.astype(bf16), params['w_hh0'].T.astype(bf16),
        (params['b_ih0'] + params['b_hh0'])[None, :],
        params['w_ih1'].T.astype(bf16), params['w_hh1'].T.astype(bf16),
        (params['b_ih1'] + params['b_hh1'])[None, :],
        params['attn_w'].T.astype(bf16), params['attn_b'][None, :],
        params['fc_w'].T.astype(bf16), params['fc_b'][None, :],
    )

    vmem = pl.BlockSpec(memory_space=pltpu.MemorySpace.VMEM)
    logits, attn_bs = pl.pallas_call(
        attention_lstm_kernel,
        out_shape=(jax.ShapeDtypeStruct((B, VOCAB), jnp.float32),
                   jax.ShapeDtypeStruct((B, S), jnp.float32)),
        in_specs=[vmem] * len(kernel_args),
        out_specs=(vmem, vmem),
        scratch_shapes=[pltpu.VMEM((S * B, HIDDEN), jnp.float32)],
    )(*kernel_args)

    attn_weights = attn_bs[:, :, None]                          # (B, S, 1)
    return logits, attn_weights


# ---- pure-JAX f32 reference for a correctness check --------------------------
def reference(params, input_ids):
    embedded = params['emb'][input_ids]
    B, S, _ = embedded.shape
    H = HIDDEN

    def lstm_layer(x, w_ih, w_hh, b_ih, b_hh):
        def step(carry, x_t):
            h, c = carry
            gates = x_t @ w_ih.T + b_ih + h @ w_hh.T + b_hh
            i = jax.nn.sigmoid(gates[:, :H])
            f = jax.nn.sigmoid(gates[:, H:2 * H])
            g = jnp.tanh(gates[:, 2 * H:3 * H])
            o = jax.nn.sigmoid(gates[:, 3 * H:])
            c = f * c + i * g
            h = o * jnp.tanh(c)
            return (h, c), h
        init = (jnp.zeros((B, H), jnp.float32), jnp.zeros((B, H), jnp.float32))
        _, ys = lax.scan(step, init, jnp.transpose(x, (1, 0, 2)))
        return jnp.transpose(ys, (1, 0, 2))

    out = lstm_layer(embedded, params['w_ih0'], params['w_hh0'],
                     params['b_ih0'], params['b_hh0'])
    out = lstm_layer(out, params['w_ih1'], params['w_hh1'],
                     params['b_ih1'], params['b_hh1'])
    last = out[:, -1:, :]
    energy = jnp.tanh(out @ params['attn_w'].T + params['attn_b'])
    scores = jnp.einsum('bsh,bth->bst', energy, last)            # (B, S, 1)
    weights = jax.nn.softmax(scores, axis=1)
    context = jnp.sum(weights * out, axis=1)
    logits = context @ params['fc_w'].T + params['fc_b']
    return logits, weights


if __name__ == "__main__":
    key = jax.random.PRNGKey(0)
    pkey, ikey = jax.random.split(key)
    params = init_params(pkey)
    input_ids = jax.random.randint(ikey, (BATCH, SEQ), 0, VOCAB, dtype=jnp.int32)

    logits, attn_weights = forward(params, input_ids)
    jax.block_until_ready((logits, attn_weights))

    assert logits.shape == (BATCH, VOCAB)
    assert attn_weights.shape == (BATCH, SEQ, 1)

    ref_logits, ref_w = reference(params, input_ids)
    # Tolerance covers bf16 MXU operands (f32 accumulation / f32 elementwise).
    assert jnp.allclose(logits, ref_logits, atol=2e-2, rtol=2e-2)
    assert jnp.allclose(attn_weights, ref_w, atol=2e-2, rtol=2e-2)

    print("KERNEL_OK")
</pallas_src>

<mosaic_0001>
module attributes {stable_mosaic.version = 11 : i64} {
  func.func @attention_lstm_kernel(%arg0: memref<16x32xbf16, #tpu.memory_space<vmem>>, %arg1: memref<32x128xbf16, #tpu.memory_space<vmem>>, %arg2: memref<32x128xbf16, #tpu.memory_space<vmem>>, %arg3: memref<1x128xf32, #tpu.memory_space<vmem>>, %arg4: memref<32x128xbf16, #tpu.memory_space<vmem>>, %arg5: memref<32x128xbf16, #tpu.memory_space<vmem>>, %arg6: memref<1x128xf32, #tpu.memory_space<vmem>>, %arg7: memref<32x32xbf16, #tpu.memory_space<vmem>>, %arg8: memref<1x32xf32, #tpu.memory_space<vmem>>, %arg9: memref<32x128xbf16, #tpu.memory_space<vmem>>, %arg10: memref<1x128xf32, #tpu.memory_space<vmem>>, %arg11: memref<2x128xf32, #tpu.memory_space<vmem>>, %arg12: memref<2x8xf32, #tpu.memory_space<vmem>>, %arg13: memref<16x32xf32, #tpu.memory_space<vmem>>) attributes {dimension_semantics = [], scalar_prefetch = 0 : i64, scratch_operands = 1 : i64, tpu.core_type = #tpu.core_type<tc>} {
    %c0 = arith.constant 0 : index
    %c0_0 = arith.constant 0 : index
    %0 = vector.load %arg0[%c0, %c0_0] : memref<16x32xbf16, #tpu.memory_space<vmem>>, vector<16x32xbf16>
    %c0_1 = arith.constant 0 : index
    %c0_2 = arith.constant 0 : index
    %1 = vector.load %arg1[%c0_1, %c0_2] : memref<32x128xbf16, #tpu.memory_space<vmem>>, vector<32x128xbf16>
    %c0_3 = arith.constant 0 : index
    %c0_4 = arith.constant 0 : index
    %2 = vector.load %arg2[%c0_3, %c0_4] : memref<32x128xbf16, #tpu.memory_space<vmem>>, vector<32x128xbf16>
    %c0_5 = arith.constant 0 : index
    %c0_6 = arith.constant 0 : index
    %3 = vector.load %arg3[%c0_5, %c0_6] : memref<1x128xf32, #tpu.memory_space<vmem>>, vector<1x128xf32>
    %cst = arith.constant dense<0.000000e+00> : vector<16x128xf32>
    %4 = tpu.matmul %0, %1, %cst {dimension_numbers = #tpu.dot_dimension_numbers<[1], [0], [0], [1], [0, 0, 1, 1], [], []>} : vector<16x32xbf16>, vector<32x128xbf16>, vector<16x128xf32> -> vector<16x128xf32>
    %5 = vector.broadcast %3 : vector<1x128xf32> to vector<16x128xf32>
    %6 = arith.addf %4, %5 : vector<16x128xf32>
    %cst_7 = arith.constant 0.000000e+00 : f32
    %7 = vector.broadcast %cst_7 : f32 to vector<2x32xf32>
    %cst_8 = arith.constant 0.000000e+00 : f32
    %8 = vector.broadcast %cst_8 : f32 to vector<2x32xf32>
    %9 = vector.extract_strided_slice %6 {offsets = [0, 0], sizes = [2, 128], strides = [1, 1]} : vector<16x128xf32> to vector<2x128xf32>
    %10 = arith.truncf %7 : vector<2x32xf32> to vector<2x32xbf16>
    %cst_9 = arith.constant dense<0.000000e+00> : vector<2x128xf32>
    %11 = tpu.matmul %10, %2, %cst_9 {dimension_numbers = #tpu.dot_dimension_numbers<[1], [0], [0], [1], [0, 0, 1, 1], [], []>} : vector<2x32xbf16>, vector<32x128xbf16>, vector<2x128xf32> -> vector<2x128xf32>
    %12 = arith.addf %9, %11 : vector<2x128xf32>
    %13 = arith.negf %12 : vector<2x128xf32>
    %14 = math.exp %13 : vector<2x128xf32>
    %cst_10 = arith.constant 1.000000e+00 : f32
    %15 = vector.broadcast %cst_10 : f32 to vector<2x128xf32>
    %16 = arith.addf %15, %14 : vector<2x128xf32>
    %17 = arith.divf %15, %16 : vector<2x128xf32>
    %18 = math.tanh %12 : vector<2x128xf32>
    %19 = vector.extract_strided_slice %17 {offsets = [0, 0], sizes = [2, 32], strides = [1, 1]} : vector<2x128xf32> to vector<2x32xf32>
    %20 = vector.extract_strided_slice %17 {offsets = [0, 32], sizes = [2, 32], strides = [1, 1]} : vector<2x128xf32> to vector<2x32xf32>
    %21 = vector.extract_strided_slice %18 {offsets = [0, 64], sizes = [2, 32], strides = [1, 1]} : vector<2x128xf32> to vector<2x32xf32>
    %22 = vector.extract_strided_slice %17 {offsets = [0, 96], sizes = [2, 32], strides = [1, 1]} : vector<2x128xf32> to vector<2x32xf32>
    %23 = arith.mulf %20, %8 : vector<2x32xf32>
    %24 = arith.mulf %19, %21 : vector<2x32xf32>
    %25 = arith.addf %23, %24 : vector<2x32xf32>
    %26 = math.tanh %25 : vector<2x32xf32>
    %27 = arith.mulf %22, %26 : vector<2x32xf32>
    %c0_11 = arith.constant 0 : index
    %c0_12 = arith.constant 0 : index
    %28 = vector.load %arg13[%c0_11, %c0_12] : memref<16x32xf32, #tpu.memory_space<vmem>>, vector<2x32xf32>
    tpu.vector_store %arg13[%c0_11, %c0_12], %27 {strides = array<i32>} : memref<16x32xf32, #tpu.memory_space<vmem>>, vector<2x32xf32>,
    %29 = vector.extract_strided_slice %6 {offsets = [2, 0], sizes = [2, 128], strides = [1, 1]} : vector<16x128xf32> to vector<2x128xf32>
    %30 = arith.truncf %27 : vector<2x32xf32> to vector<2x32xbf16>
    %cst_13 = arith.constant dense<0.000000e+00> : vector<2x128xf32>
    %31 = tpu.matmul %30, %2, %cst_13 {dimension_numbers = #tpu.dot_dimension_numbers<[1], [0], [0], [1], [0, 0, 1, 1], [], []>} : vector<2x32xbf16>, vector<32x128xbf16>, vector<2x128xf32> -> vector<2x128xf32>
    %32 = arith.addf %29, %31 : vector<2x128xf32>
    %33 = arith.negf %32 : vector<2x128xf32>
    %34 = math.exp %33 : vector<2x128xf32>
    %cst_14 = arith.constant 1.000000e+00 : f32
    %35 = vector.broadcast %cst_14 : f32 to vector<2x128xf32>
    %36 = arith.addf %35, %34 : vector<2x128xf32>
    %37 = arith.divf %35, %36 : vector<2x128xf32>
    %38 = math.tanh %32 : vector<2x128xf32>
    %39 = vector.extract_strided_slice %37 {offsets = [0, 0], sizes = [2, 32], strides = [1, 1]} : vector<2x128xf32> to vector<2x32xf32>
    %40 = vector.extract_strided_slice %37 {offsets = [0, 32], sizes = [2, 32], strides = [1, 1]} : vector<2x128xf32> to vector<2x32xf32>
    %41 = vector.extract_strided_slice %38 {offsets = [0, 64], sizes = [2, 32], strides = [1, 1]} : vector<2x128xf32> to vector<2x32xf32>
    %42 = vector.extract_strided_slice %37 {offsets = [0, 96], sizes = [2, 32], strides = [1, 1]} : vector<2x128xf32> to vector<2x32xf32>
    %43 = arith.mulf %40, %25 : vector<2x32xf32>
    %44 = arith.mulf %39, %41 : vector<2x32xf32>
    %45 = arith.addf %43, %44 : vector<2x32xf32>
    %46 = math.tanh %45 : vector<2x32xf32>
    %47 = arith.mulf %42, %46 : vector<2x32xf32>
    %c2 = arith.constant 2 : index
    %c0_15 = arith.constant 0 : index
    %48 = vector.load %arg13[%c2, %c0_15] : memref<16x32xf32, #tpu.memory_space<vmem>>, vector<2x32xf32>
    tpu.vector_store %arg13[%c2, %c0_15], %47 {strides = array<i32>} : memref<16x32xf32, #tpu.memory_space<vmem>>, vector<2x32xf32>,
    %49 = vector.extract_strided_slice %6 {offsets = [4, 0], sizes = [2, 128], strides = [1, 1]} : vector<16x128xf32> to vector<2x128xf32>
    %50 = arith.truncf %47 : vector<2x32xf32> to vector<2x32xbf16>
    %cst_16 = arith.constant dense<0.000000e+00> : vector<2x128xf32>
    %51 = tpu.matmul %50, %2, %cst_16 {dimension_numbers = #tpu.dot_dimension_numbers<[1], [0], [0], [1], [0, 0, 1, 1], [], []>} : vector<2x32xbf16>, vector<32x128xbf16>, vector<2x128xf32> -> vector<2x128xf32>
    %52 = arith.addf %49, %51 : vector<2x128xf32>
    %53 = arith.negf %52 : vector<2x128xf32>
    %54 = math.exp %53 : vector<2x128xf32>
    %cst_17 = arith.constant 1.000000e+00 : f32
    %55 = vector.broadcast %cst_17 : f32 to vector<2x128xf32>
    %56 = arith.addf %55, %54 : vector<2x128xf32>
    %57 = arith.divf %55, %56 : vector<2x128xf32>
    %58 = math.tanh %52 : vector<2x128xf32>
    %59 = vector.extract_strided_slice %57 {offsets = [0, 0], sizes = [2, 32], strides = [1, 1]} : vector<2x128xf32> to vector<2x32xf32>
    %60 = vector.extract_strided_slice %57 {offsets = [0, 32], sizes = [2, 32], strides = [1, 1]} : vector<2x128xf32> to vector<2x32xf32>
    %61 = vector.extract_strided_slice %58 {offsets = [0, 64], sizes = [2, 32], strides = [1, 1]} : vector<2x128xf32> to vector<2x32xf32>
    %62 = vector.extract_strided_slice %57 {offsets = [0, 96], sizes = [2, 32], strides = [1, 1]} : vector<2x128xf32> to vector<2x32xf32>
    %63 = arith.mulf %60, %45 : vector<2x32xf32>
    %64 = arith.mulf %59, %61 : vector<2x32xf32>
    %65 = arith.addf %63, %64 : vector<2x32xf32>
    %66 = math.tanh %65 : vector<2x32xf32>
    %67 = arith.mulf %62, %66 : vector<2x32xf32>
    %c4 = arith.constant 4 : index
    %c0_18 = arith.constant 0 : index
    %68 = vector.load %arg13[%c4, %c0_18] : memref<16x32xf32, #tpu.memory_space<vmem>>, vector<2x32xf32>
    tpu.vector_store %arg13[%c4, %c0_18], %67 {strides = array<i32>} : memref<16x32xf32, #tpu.memory_space<vmem>>, vector<2x32xf32>,
    %69 = vector.extract_strided_slice %6 {offsets = [6, 0], sizes = [2, 128], strides = [1, 1]} : vector<16x128xf32> to vector<2x128xf32>
    %70 = arith.truncf %67 : vector<2x32xf32> to vector<2x32xbf16>
    %cst_19 = arith.constant dense<0.000000e+00> : vector<2x128xf32>
    %71 = tpu.matmul %70, %2, %cst_19 {dimension_numbers = #tpu.dot_dimension_numbers<[1], [0], [0], [1], [0, 0, 1, 1], [], []>} : vector<2x32xbf16>, vector<32x128xbf16>, vector<2x128xf32> -> vector<2x128xf32>
    %72 = arith.addf %69, %71 : vector<2x128xf32>
    %73 = arith.negf %72 : vector<2x128xf32>
    %74 = math.exp %73 : vector<2x128xf32>
    %cst_20 = arith.constant 1.000000e+00 : f32
    %75 = vector.broadcast %cst_20 : f32 to vector<2x128xf32>
    %76 = arith.addf %75, %74 : vector<2x128xf32>
    %77 = arith.divf %75, %76 : vector<2x128xf32>
    %78 = math.tanh %72 : vector<2x128xf32>
    %79 = vector.extract_strided_slice %77 {offsets = [0, 0], sizes = [2, 32], strides = [1, 1]} : vector<2x128xf32> to vector<2x32xf32>
    %80 = vector.extract_strided_slice %77 {offsets = [0, 32], sizes = [2, 32], strides = [1, 1]} : vector<2x128xf32> to vector<2x32xf32>
    %81 = vector.extract_strided_slice %78 {offsets = [0, 64], sizes = [2, 32], strides = [1, 1]} : vector<2x128xf32> to vector<2x32xf32>
    %82 = vector.extract_strided_slice %77 {offsets = [0, 96], sizes = [2, 32], strides = [1, 1]} : vector<2x128xf32> to vector<2x32xf32>
    %83 = arith.mulf %80, %65 : vector<2x32xf32>
    %84 = arith.mulf %79, %81 : vector<2x32xf32>
    %85 = arith.addf %83, %84 : vector<2x32xf32>
    %86 = math.tanh %85 : vector<2x32xf32>
    %87 = arith.mulf %82, %86 : vector<2x32xf32>
    %c6 = arith.constant 6 : index
    %c0_21 = arith.constant 0 : index
    %88 = vector.load %arg13[%c6, %c0_21] : memref<16x32xf32, #tpu.memory_space<vmem>>, vector<2x32xf32>
    tpu.vector_store %arg13[%c6, %c0_21], %87 {strides = array<i32>} : memref<16x32xf32, #tpu.memory_space<vmem>>, vector<2x32xf32>,
    %89 = vector.extract_strided_slice %6 {offsets = [8, 0], sizes = [2, 128], strides = [1, 1]} : vector<16x128xf32> to vector<2x128xf32>
    %90 = arith.truncf %87 : vector<2x32xf32> to vector<2x32xbf16>
    %cst_22 = arith.constant dense<0.000000e+00> : vector<2x128xf32>
    %91 = tpu.matmul %90, %2, %cst_22 {dimension_numbers = #tpu.dot_dimension_numbers<[1], [0], [0], [1], [0, 0, 1, 1], [], []>} : vector<2x32xbf16>, vector<32x128xbf16>, vector<2x128xf32> -> vector<2x128xf32>
    %92 = arith.addf %89, %91 : vector<2x128xf32>
    %93 = arith.negf %92 : vector<2x128xf32>
    %94 = math.exp %93 : vector<2x128xf32>
    %cst_23 = arith.constant 1.000000e+00 : f32
    %95 = vector.broadcast %cst_23 : f32 to vector<2x128xf32>
    %96 = arith.addf %95, %94 : vector<2x128xf32>
    %97 = arith.divf %95, %96 : vector<2x128xf32>
    %98 = math.tanh %92 : vector<2x128xf32>
    %99 = vector.extract_strided_slice %97 {offsets = [0, 0], sizes = [2, 32], strides = [1, 1]} : vector<2x128xf32> to vector<2x32xf32>
    %100 = vector.extract_strided_slice %97 {offsets = [0, 32], sizes = [2, 32], strides = [1, 1]} : vector<2x128xf32> to vector<2x32xf32>
    %101 = vector.extract_strided_slice %98 {offsets = [0, 64], sizes = [2, 32], strides = [1, 1]} : vector<2x128xf32> to vector<2x32xf32>
    %102 = vector.extract_strided_slice %97 {offsets = [0, 96], sizes = [2, 32], strides = [1, 1]} : vector<2x128xf32> to vector<2x32xf32>
    %103 = arith.mulf %100, %85 : vector<2x32xf32>
    %104 = arith.mulf %99, %101 : vector<2x32xf32>
    %105 = arith.addf %103, %104 : vector<2x32xf32>
    %106 = math.tanh %105 : vector<2x32xf32>
    %107 = arith.mulf %102, %106 : vector<2x32xf32>
    %c8 = arith.constant 8 : index
    %c0_24 = arith.constant 0 : index
    %108 = vector.load %arg13[%c8, %c0_24] : memref<16x32xf32, #tpu.memory_space<vmem>>, vector<2x32xf32>
    tpu.vector_store %arg13[%c8, %c0_24], %107 {strides = array<i32>} : memref<16x32xf32, #tpu.memory_space<vmem>>, vector<2x32xf32>,
    %109 = vector.extract_strided_slice %6 {offsets = [10, 0], sizes = [2, 128], strides = [1, 1]} : vector<16x128xf32> to vector<2x128xf32>
    %110 = arith.truncf %107 : vector<2x32xf32> to vector<2x32xbf16>
    %cst_25 = arith.constant dense<0.000000e+00> : vector<2x128xf32>
    %111 = tpu.matmul %110, %2, %cst_25 {dimension_numbers = #tpu.dot_dimension_numbers<[1], [0], [0], [1], [0, 0, 1, 1], [], []>} : vector<2x32xbf16>, vector<32x128xbf16>, vector<2x128xf32> -> vector<2x128xf32>
    %112 = arith.addf %109, %111 : vector<2x128xf32>
    %113 = arith.negf %112 : vector<2x128xf32>
    %114 = math.exp %113 : vector<2x128xf32>
    %cst_26 = arith.constant 1.000000e+00 : f32
    %115 = vector.broadcast %cst_26 : f32 to vector<2x128xf32>
    %116 = arith.addf %115, %114 : vector<2x128xf32>
    %117 = arith.divf %115, %116 : vector<2x128xf32>
    %118 = math.tanh %112 : vector<2x128xf32>
    %119 = vector.extract_strided_slice %117 {offsets = [0, 0], sizes = [2, 32], strides = [1, 1]} : vector<2x128xf32> to vector<2x32xf32>
    %120 = vector.extract_strided_slice %117 {offsets = [0, 32], sizes = [2, 32], strides = [1, 1]} : vector<2x128xf32> to vector<2x32xf32>
    %121 = vector.extract_strided_slice %118 {offsets = [0, 64], sizes = [2, 32], strides = [1, 1]} : vector<2x128xf32> to vector<2x32xf32>
    %122 = vector.extract_strided_slice %117 {offsets = [0, 96], sizes = [2, 32], strides = [1, 1]} : vector<2x128xf32> to vector<2x32xf32>
    %123 = arith.mulf %120, %105 : vector<2x32xf32>
    %124 = arith.mulf %119, %121 : vector<2x32xf32>
    %125 = arith.addf %123, %124 : vector<2x32xf32>
    %126 = math.tanh %125 : vector<2x32xf32>
    %127 = arith.mulf %122, %126 : vector<2x32xf32>
    %c10 = arith.constant 10 : index
    %c0_27 = arith.constant 0 : index
    %128 = vector.load %arg13[%c10, %c0_27] : memref<16x32xf32, #tpu.memory_space<vmem>>, vector<2x32xf32>
    tpu.vector_store %arg13[%c10, %c0_27], %127 {strides = array<i32>} : memref<16x32xf32, #tpu.memory_space<vmem>>, vector<2x32xf32>,
    %129 = vector.extract_strided_slice %6 {offsets = [12, 0], sizes = [2, 128], strides = [1, 1]} : vector<16x128xf32> to vector<2x128xf32>
    %130 = arith.truncf %127 : vector<2x32xf32> to vector<2x32xbf16>
    %cst_28 = arith.constant dense<0.000000e+00> : vector<2x128xf32>
    %131 = tpu.matmul %130, %2, %cst_28 {dimension_numbers = #tpu.dot_dimension_numbers<[1], [0], [0], [1], [0, 0, 1, 1], [], []>} : vector<2x32xbf16>, vector<32x128xbf16>, vector<2x128xf32> -> vector<2x128xf32>
    %132 = arith.addf %129, %131 : vector<2x128xf32>
    %133 = arith.negf %132 : vector<2x128xf32>
    %134 = math.exp %133 : vector<2x128xf32>
    %cst_29 = arith.constant 1.000000e+00 : f32
    %135 = vector.broadcast %cst_29 : f32 to vector<2x128xf32>
    %136 = arith.addf %135, %134 : vector<2x128xf32>
    %137 = arith.divf %135, %136 : vector<2x128xf32>
    %138 = math.tanh %132 : vector<2x128xf32>
    %139 = vector.extract_strided_slice %137 {offsets = [0, 0], sizes = [2, 32], strides = [1, 1]} : vector<2x128xf32> to vector<2x32xf32>
    %140 = vector.extract_strided_slice %137 {offsets = [0, 32], sizes = [2, 32], strides = [1, 1]} : vector<2x128xf32> to vector<2x32xf32>
    %141 = vector.extract_strided_slice %138 {offsets = [0, 64], sizes = [2, 32], strides = [1, 1]} : vector<2x128xf32> to vector<2x32xf32>
    %142 = vector.extract_strided_slice %137 {offsets = [0, 96], sizes = [2, 32], strides = [1, 1]} : vector<2x128xf32> to vector<2x32xf32>
    %143 = arith.mulf %140, %125 : vector<2x32xf32>
    %144 = arith.mulf %139, %141 : vector<2x32xf32>
    %145 = arith.addf %143, %144 : vector<2x32xf32>
    %146 = math.tanh %145 : vector<2x32xf32>
    %147 = arith.mulf %142, %146 : vector<2x32xf32>
    %c12 = arith.constant 12 : index
    %c0_30 = arith.constant 0 : index
    %148 = vector.load %arg13[%c12, %c0_30] : memref<16x32xf32, #tpu.memory_space<vmem>>, vector<2x32xf32>
    tpu.vector_store %arg13[%c12, %c0_30], %147 {strides = array<i32>} : memref<16x32xf32, #tpu.memory_space<vmem>>, vector<2x32xf32>,
    %149 = vector.extract_strided_slice %6 {offsets = [14, 0], sizes = [2, 128], strides = [1, 1]} : vector<16x128xf32> to vector<2x128xf32>
    %150 = arith.truncf %147 : vector<2x32xf32> to vector<2x32xbf16>
    %cst_31 = arith.constant dense<0.000000e+00> : vector<2x128xf32>
    %151 = tpu.matmul %150, %2, %cst_31 {dimension_numbers = #tpu.dot_dimension_numbers<[1], [0], [0], [1], [0, 0, 1, 1], [], []>} : vector<2x32xbf16>, vector<32x128xbf16>, vector<2x128xf32> -> vector<2x128xf32>
    %152 = arith.addf %149, %151 : vector<2x128xf32>
    %153 = arith.negf %152 : vector<2x128xf32>
    %154 = math.exp %153 : vector<2x128xf32>
    %cst_32 = arith.constant 1.000000e+00 : f32
    %155 = vector.broadcast %cst_32 : f32 to vector<2x128xf32>
    %156 = arith.addf %155, %154 : vector<2x128xf32>
    %157 = arith.divf %155, %156 : vector<2x128xf32>
    %158 = math.tanh %152 : vector<2x128xf32>
    %159 = vector.extract_strided_slice %157 {offsets = [0, 0], sizes = [2, 32], strides = [1, 1]} : vector<2x128xf32> to vector<2x32xf32>
    %160 = vector.extract_strided_slice %157 {offsets = [0, 32], sizes = [2, 32], strides = [1, 1]} : vector<2x128xf32> to vector<2x32xf32>
    %161 = vector.extract_strided_slice %158 {offsets = [0, 64], sizes = [2, 32], strides = [1, 1]} : vector<2x128xf32> to vector<2x32xf32>
    %162 = vector.extract_strided_slice %157 {offsets = [0, 96], sizes = [2, 32], strides = [1, 1]} : vector<2x128xf32> to vector<2x32xf32>
    %163 = arith.mulf %160, %145 : vector<2x32xf32>
    %164 = arith.mulf %159, %161 : vector<2x32xf32>
    %165 = arith.addf %163, %164 : vector<2x32xf32>
    %166 = math.tanh %165 : vector<2x32xf32>
    %167 = arith.mulf %162, %166 : vector<2x32xf32>
    %c14 = arith.constant 14 : index
    %c0_33 = arith.constant 0 : index
    %168 = vector.load %arg13[%c14, %c0_33] : memref<16x32xf32, #tpu.memory_space<vmem>>, vector<2x32xf32>
    tpu.vector_store %arg13[%c14, %c0_33], %167 {strides = array<i32>} : memref<16x32xf32, #tpu.memory_space<vmem>>, vector<2x32xf32>,
    %c0_34 = arith.constant 0 : index
    %c0_35 = arith.constant 0 : index
    %169 = vector.load %arg13[%c0_34, %c0_35] : memref<16x32xf32, #tpu.memory_space<vmem>>, vector<16x32xf32>
    %170 = arith.truncf %169 : vector<16x32xf32> to vector<16x32xbf16>
    %c0_36 = arith.constant 0 : index
    %c0_37 = arith.constant 0 : index
    %171 = vector.load %arg4[%c0_36, %c0_37] : memref<32x128xbf16, #tpu.memory_space<vmem>>, vector<32x128xbf16>
    %c0_38 = arith.constant 0 : index
    %c0_39 = arith.constant 0 : index
    %172 = vector.load %arg5[%c0_38, %c0_39] : memref<32x128xbf16, #tpu.memory_space<vmem>>, vector<32x128xbf16>
    %c0_40 = arith.constant 0 : index
    %c0_41 = arith.constant 0 : index
    %173 = vector.load %arg6[%c0_40, %c0_41] : memref<1x128xf32, #tpu.memory_space<vmem>>, vector<1x128xf32>
    %cst_42 = arith.constant dense<0.000000e+00> : vector<16x128xf32>
    %174 = tpu.matmul %170, %171, %cst_42 {dimension_numbers = #tpu.dot_dimension_numbers<[1], [0], [0], [1], [0, 0, 1, 1], [], []>} : vector<16x32xbf16>, vector<32x128xbf16>, vector<16x128xf32> -> vector<16x128xf32>
    %175 = vector.broadcast %173 : vector<1x128xf32> to vector<16x128xf32>
    %176 = arith.addf %174, %175 : vector<16x128xf32>
    %cst_43 = arith.constant 0.000000e+00 : f32
    %177 = vector.broadcast %cst_43 : f32 to vector<2x32xf32>
    %cst_44 = arith.constant 0.000000e+00 : f32
    %178 = vector.broadcast %cst_44 : f32 to vector<2x32xf32>
    %179 = vector.extract_strided_slice %176 {offsets = [0, 0], sizes = [2, 128], strides = [1, 1]} : vector<16x128xf32> to vector<2x128xf32>
    %180 = arith.truncf %177 : vector<2x32xf32> to vector<2x32xbf16>
    %cst_45 = arith.constant dense<0.000000e+00> : vector<2x128xf32>
    %181 = tpu.matmul %180, %172, %cst_45 {dimension_numbers = #tpu.dot_dimension_numbers<[1], [0], [0], [1], [0, 0, 1, 1], [], []>} : vector<2x32xbf16>, vector<32x128xbf16>, vector<2x128xf32> -> vector<2x128xf32>
    %182 = arith.addf %179, %181 : vector<2x128xf32>
    %183 = arith.negf %182 : vector<2x128xf32>
    %184 = math.exp %183 : vector<2x128xf32>
    %cst_46 = arith.constant 1.000000e+00 : f32
    %185 = vector.broadcast %cst_46 : f32 to vector<2x128xf32>
    %186 = arith.addf %185, %184 : vector<2x128xf32>
    %187 = arith.divf %185, %186 : vector<2x128xf32>
    %188 = math.tanh %182 : vector<2x128xf32>
    %189 = vector.extract_strided_slice %187 {offsets = [0, 0], sizes = [2, 32], strides = [1, 1]} : vector<2x128xf32> to vector<2x32xf32>
    %190 = vector.extract_strided_slice %187 {offsets = [0, 32], sizes = [2, 32], strides = [1, 1]} : vector<2x128xf32> to vector<2x32xf32>
    %191 = vector.extract_strided_slice %188 {offsets = [0, 64], sizes = [2, 32], strides = [1, 1]} : vector<2x128xf32> to vector<2x32xf32>
    %192 = vector.extract_strided_slice %187 {offsets = [0, 96], sizes = [2, 32], strides = [1, 1]} : vector<2x128xf32> to vector<2x32xf32>
    %193 = arith.mulf %190, %178 : vector<2x32xf32>
    %194 = arith.mulf %189, %191 : vector<2x32xf32>
    %195 = arith.addf %193, %194 : vector<2x32xf32>
    %196 = math.tanh %195 : vector<2x32xf32>
    %197 = arith.mulf %192, %196 : vector<2x32xf32>
    %c0_47 = arith.constant 0 : index
    %c0_48 = arith.constant 0 : index
    %198 = vector.load %arg13[%c0_47, %c0_48] : memref<16x32xf32, #tpu.memory_space<vmem>>, vector<2x32xf32>
    tpu.vector_store %arg13[%c0_47, %c0_48], %197 {strides = array<i32>} : memref<16x32xf32, #tpu.memory_space<vmem>>, vector<2x32xf32>,
    %199 = vector.extract_strided_slice %176 {offsets = [2, 0], sizes = [2, 128], strides = [1, 1]} : vector<16x128xf32> to vector<2x128xf32>
    %200 = arith.truncf %197 : vector<2x32xf32> to vector<2x32xbf16>
    %cst_49 = arith.constant dense<0.000000e+00> : vector<2x128xf32>
    %201 = tpu.matmul %200, %172, %cst_49 {dimension_numbers = #tpu.dot_dimension_numbers<[1], [0], [0], [1], [0, 0, 1, 1], [], []>} : vector<2x32xbf16>, vector<32x128xbf16>, vector<2x128xf32> -> vector<2x128xf32>
    %202 = arith.addf %199, %201 : vector<2x128xf32>
    %203 = arith.negf %202 : vector<2x128xf32>
    %204 = math.exp %203 : vector<2x128xf32>
    %cst_50 = arith.constant 1.000000e+00 : f32
    %205 = vector.broadcast %cst_50 : f32 to vector<2x128xf32>
    %206 = arith.addf %205, %204 : vector<2x128xf32>
    %207 = arith.divf %205, %206 : vector<2x128xf32>
    %208 = math.tanh %202 : vector<2x128xf32>
    %209 = vector.extract_strided_slice %207 {offsets = [0, 0], sizes = [2, 32], strides = [1, 1]} : vector<2x128xf32> to vector<2x32xf32>
    %210 = vector.extract_strided_slice %207 {offsets = [0, 32], sizes = [2, 32], strides = [1, 1]} : vector<2x128xf32> to vector<2x32xf32>
    %211 = vector.extract_strided_slice %208 {offsets = [0, 64], sizes = [2, 32], strides = [1, 1]} : vector<2x128xf32> to vector<2x32xf32>
    %212 = vector.extract_strided_slice %207 {offsets = [0, 96], sizes = [2, 32], strides = [1, 1]} : vector<2x128xf32> to vector<2x32xf32>
    %213 = arith.mulf %210, %195 : vector<2x32xf32>
    %214 = arith.mulf %209, %211 : vector<2x32xf32>
    %215 = arith.addf %213, %214 : vector<2x32xf32>
    %216 = math.tanh %215 : vector<2x32xf32>
    %217 = arith.mulf %212, %216 : vector<2x32xf32>
    %c2_51 = arith.constant 2 : index
    %c0_52 = arith.constant 0 : index
    %218 = vector.load %arg13[%c2_51, %c0_52] : memref<16x32xf32, #tpu.memory_space<vmem>>, vector<2x32xf32>
    tpu.vector_store %arg13[%c2_51, %c0_52], %217 {strides = array<i32>} : memref<16x32xf32, #tpu.memory_space<vmem>>, vector<2x32xf32>,
    %219 = vector.extract_strided_slice %176 {offsets = [4, 0], sizes = [2, 128], strides = [1, 1]} : vector<16x128xf32> to vector<2x128xf32>
    %220 = arith.truncf %217 : vector<2x32xf32> to vector<2x32xbf16>
    %cst_53 = arith.constant dense<0.000000e+00> : vector<2x128xf32>
    %221 = tpu.matmul %220, %172, %cst_53 {dimension_numbers = #tpu.dot_dimension_numbers<[1], [0], [0], [1], [0, 0, 1, 1], [], []>} : vector<2x32xbf16>, vector<32x128xbf16>, vector<2x128xf32> -> vector<2x128xf32>
    %222 = arith.addf %219, %221 : vector<2x128xf32>
    %223 = arith.negf %222 : vector<2x128xf32>
    %224 = math.exp %223 : vector<2x128xf32>
    %cst_54 = arith.constant 1.000000e+00 : f32
    %225 = vector.broadcast %cst_54 : f32 to vector<2x128xf32>
    %226 = arith.addf %225, %224 : vector<2x128xf32>
    %227 = arith.divf %225, %226 : vector<2x128xf32>
    %228 = math.tanh %222 : vector<2x128xf32>
    %229 = vector.extract_strided_slice %227 {offsets = [0, 0], sizes = [2, 32], strides = [1, 1]} : vector<2x128xf32> to vector<2x32xf32>
    %230 = vector.extract_strided_slice %227 {offsets = [0, 32], sizes = [2, 32], strides = [1, 1]} : vector<2x128xf32> to vector<2x32xf32>
    %231 = vector.extract_strided_slice %228 {offsets = [0, 64], sizes = [2, 32], strides = [1, 1]} : vector<2x128xf32> to vector<2x32xf32>
    %232 = vector.extract_strided_slice %227 {offsets = [0, 96], sizes = [2, 32], strides = [1, 1]} : vector<2x128xf32> to vector<2x32xf32>
    %233 = arith.mulf %230, %215 : vector<2x32xf32>
    %234 = arith.mulf %229, %231 : vector<2x32xf32>
    %235 = arith.addf %233, %234 : vector<2x32xf32>
    %236 = math.tanh %235 : vector<2x32xf32>
    %237 = arith.mulf %232, %236 : vector<2x32xf32>
    %c4_55 = arith.constant 4 : index
    %c0_56 = arith.constant 0 : index
    %238 = vector.load %arg13[%c4_55, %c0_56] : memref<16x32xf32, #tpu.memory_space<vmem>>, vector<2x32xf32>
    tpu.vector_store %arg13[%c4_55, %c0_56], %237 {strides = array<i32>} : memref<16x32xf32, #tpu.memory_space<vmem>>, vector<2x32xf32>,
    %239 = vector.extract_strided_slice %176 {offsets = [6, 0], sizes = [2, 128], strides = [1, 1]} : vector<16x128xf32> to vector<2x128xf32>
    %240 = arith.truncf %237 : vector<2x32xf32> to vector<2x32xbf16>
    %cst_57 = arith.constant dense<0.000000e+00> : vector<2x128xf32>
    %241 = tpu.matmul %240, %172, %cst_57 {dimension_numbers = #tpu.dot_dimension_numbers<[1], [0], [0], [1], [0, 0, 1, 1], [], []>} : vector<2x32xbf16>, vector<32x128xbf16>, vector<2x128xf32> -> vector<2x128xf32>
    %242 = arith.addf %239, %241 : vector<2x128xf32>
    %243 = arith.negf %242 : vector<2x128xf32>
    %244 = math.exp %243 : vector<2x128xf32>
    %cst_58 = arith.constant 1.000000e+00 : f32
    %245 = vector.broadcast %cst_58 : f32 to vector<2x128xf32>
    %246 = arith.addf %245, %244 : vector<2x128xf32>
    %247 = arith.divf %245, %246 : vector<2x128xf32>
    %248 = math.tanh %242 : vector<2x128xf32>
    %249 = vector.extract_strided_slice %247 {offsets = [0, 0], sizes = [2, 32], strides = [1, 1]} : vector<2x128xf32> to vector<2x32xf32>
    %250 = vector.extract_strided_slice %247 {offsets = [0, 32], sizes = [2, 32], strides = [1, 1]} : vector<2x128xf32> to vector<2x32xf32>
    %251 = vector.extract_strided_slice %248 {offsets = [0, 64], sizes = [2, 32], strides = [1, 1]} : vector<2x128xf32> to vector<2x32xf32>
    %252 = vector.extract_strided_slice %247 {offsets = [0, 96], sizes = [2, 32], strides = [1, 1]} : vector<2x128xf32> to vector<2x32xf32>
    %253 = arith.mulf %250, %235 : vector<2x32xf32>
    %254 = arith.mulf %249, %251 : vector<2x32xf32>
    %255 = arith.addf %253, %254 : vector<2x32xf32>
    %256 = math.tanh %255 : vector<2x32xf32>
    %257 = arith.mulf %252, %256 : vector<2x32xf32>
    %c6_59 = arith.constant 6 : index
    %c0_60 = arith.constant 0 : index
    %258 = vector.load %arg13[%c6_59, %c0_60] : memref<16x32xf32, #tpu.memory_space<vmem>>, vector<2x32xf32>
    tpu.vector_store %arg13[%c6_59, %c0_60], %257 {strides = array<i32>} : memref<16x32xf32, #tpu.memory_space<vmem>>, vector<2x32xf32>,
    %259 = vector.extract_strided_slice %176 {offsets = [8, 0], sizes = [2, 128], strides = [1, 1]} : vector<16x128xf32> to vector<2x128xf32>
    %260 = arith.truncf %257 : vector<2x32xf32> to vector<2x32xbf16>
    %cst_61 = arith.constant dense<0.000000e+00> : vector<2x128xf32>
    %261 = tpu.matmul %260, %172, %cst_61 {dimension_numbers = #tpu.dot_dimension_numbers<[1], [0], [0], [1], [0, 0, 1, 1], [], []>} : vector<2x32xbf16>, vector<32x128xbf16>, vector<2x128xf32> -> vector<2x128xf32>
    %262 = arith.addf %259, %261 : vector<2x128xf32>
    %263 = arith.negf %262 : vector<2x128xf32>
    %264 = math.exp %263 : vector<2x128xf32>
    %cst_62 = arith.constant 1.000000e+00 : f32
    %265 = vector.broadcast %cst_62 : f32 to vector<2x128xf32>
    %266 = arith.addf %265, %264 : vector<2x128xf32>
    %267 = arith.divf %265, %266 : vector<2x128xf32>
    %268 = math.tanh %262 : vector<2x128xf32>
    %269 = vector.extract_strided_slice %267 {offsets = [0, 0], sizes = [2, 32], strides = [1, 1]} : vector<2x128xf32> to vector<2x32xf32>
    %270 = vector.extract_strided_slice %267 {offsets = [0, 32], sizes = [2, 32], strides = [1, 1]} : vector<2x128xf32> to vector<2x32xf32>
    %271 = vector.extract_strided_slice %268 {offsets = [0, 64], sizes = [2, 32], strides = [1, 1]} : vector<2x128xf32> to vector<2x32xf32>
    %272 = vector.extract_strided_slice %267 {offsets = [0, 96], sizes = [2, 32], strides = [1, 1]} : vector<2x128xf32> to vector<2x32xf32>
    %273 = arith.mulf %270, %255 : vector<2x32xf32>
    %274 = arith.mulf %269, %271 : vector<2x32xf32>
    %275 = arith.addf %273, %274 : vector<2x32xf32>
    %276 = math.tanh %275 : vector<2x32xf32>
    %277 = arith.mulf %272, %276 : vector<2x32xf32>
    %c8_63 = arith.constant 8 : index
    %c0_64 = arith.constant 0 : index
    %278 = vector.load %arg13[%c8_63, %c0_64] : memref<16x32xf32, #tpu.memory_space<vmem>>, vector<2x32xf32>
    tpu.vector_store %arg13[%c8_63, %c0_64], %277 {strides = array<i32>} : memref<16x32xf32, #tpu.memory_space<vmem>>, vector<2x32xf32>,
    %279 = vector.extract_strided_slice %176 {offsets = [10, 0], sizes = [2, 128], strides = [1, 1]} : vector<16x128xf32> to vector<2x128xf32>
    %280 = arith.truncf %277 : vector<2x32xf32> to vector<2x32xbf16>
    %cst_65 = arith.constant dense<0.000000e+00> : vector<2x128xf32>
    %281 = tpu.matmul %280, %172, %cst_65 {dimension_numbers = #tpu.dot_dimension_numbers<[1], [0], [0], [1], [0, 0, 1, 1], [], []>} : vector<2x32xbf16>, vector<32x128xbf16>, vector<2x128xf32> -> vector<2x128xf32>
    %282 = arith.addf %279, %281 : vector<2x128xf32>
    %283 = arith.negf %282 : vector<2x128xf32>
    %284 = math.exp %283 : vector<2x128xf32>
    %cst_66 = arith.constant 1.000000e+00 : f32
    %285 = vector.broadcast %cst_66 : f32 to vector<2x128xf32>
    %286 = arith.addf %285, %284 : vector<2x128xf32>
    %287 = arith.divf %285, %286 : vector<2x128xf32>
    %288 = math.tanh %282 : vector<2x128xf32>
    %289 = vector.extract_strided_slice %287 {offsets = [0, 0], sizes = [2, 32], strides = [1, 1]} : vector<2x128xf32> to vector<2x32xf32>
    %290 = vector.extract_strided_slice %287 {offsets = [0, 32], sizes = [2, 32], strides = [1, 1]} : vector<2x128xf32> to vector<2x32xf32>
    %291 = vector.extract_strided_slice %288 {offsets = [0, 64], sizes = [2, 32], strides = [1, 1]} : vector<2x128xf32> to vector<2x32xf32>
    %292 = vector.extract_strided_slice %287 {offsets = [0, 96], sizes = [2, 32], strides = [1, 1]} : vector<2x128xf32> to vector<2x32xf32>
    %293 = arith.mulf %290, %275 : vector<2x32xf32>
    %294 = arith.mulf %289, %291 : vector<2x32xf32>
    %295 = arith.addf %293, %294 : vector<2x32xf32>
    %296 = math.tanh %295 : vector<2x32xf32>
    %297 = arith.mulf %292, %296 : vector<2x32xf32>
    %c10_67 = arith.constant 10 : index
    %c0_68 = arith.constant 0 : index
    %298 = vector.load %arg13[%c10_67, %c0_68] : memref<16x32xf32, #tpu.memory_space<vmem>>, vector<2x32xf32>
    tpu.vector_store %arg13[%c10_67, %c0_68], %297 {strides = array<i32>} : memref<16x32xf32, #tpu.memory_space<vmem>>, vector<2x32xf32>,
    %299 = vector.extract_strided_slice %176 {offsets = [12, 0], sizes = [2, 128], strides = [1, 1]} : vector<16x128xf32> to vector<2x128xf32>
    %300 = arith.truncf %297 : vector<2x32xf32> to vector<2x32xbf16>
    %cst_69 = arith.constant dense<0.000000e+00> : vector<2x128xf32>
    %301 = tpu.matmul %300, %172, %cst_69 {dimension_numbers = #tpu.dot_dimension_numbers<[1], [0], [0], [1], [0, 0, 1, 1], [], []>} : vector<2x32xbf16>, vector<32x128xbf16>, vector<2x128xf32> -> vector<2x128xf32>
    %302 = arith.addf %299, %301 : vector<2x128xf32>
    %303 = arith.negf %302 : vector<2x128xf32>
    %304 = math.exp %303 : vector<2x128xf32>
    %cst_70 = arith.constant 1.000000e+00 : f32
    %305 = vector.broadcast %cst_70 : f32 to vector<2x128xf32>
    %306 = arith.addf %305, %304 : vector<2x128xf32>
    %307 = arith.divf %305, %306 : vector<2x128xf32>
    %308 = math.tanh %302 : vector<2x128xf32>
    %309 = vector.extract_strided_slice %307 {offsets = [0, 0], sizes = [2, 32], strides = [1, 1]} : vector<2x128xf32> to vector<2x32xf32>
    %310 = vector.extract_strided_slice %307 {offsets = [0, 32], sizes = [2, 32], strides = [1, 1]} : vector<2x128xf32> to vector<2x32xf32>
    %311 = vector.extract_strided_slice %308 {offsets = [0, 64], sizes = [2, 32], strides = [1, 1]} : vector<2x128xf32> to vector<2x32xf32>
    %312 = vector.extract_strided_slice %307 {offsets = [0, 96], sizes = [2, 32], strides = [1, 1]} : vector<2x128xf32> to vector<2x32xf32>
    %313 = arith.mulf %310, %295 : vector<2x32xf32>
    %314 = arith.mulf %309, %311 : vector<2x32xf32>
    %315 = arith.addf %313, %314 : vector<2x32xf32>
    %316 = math.tanh %315 : vector<2x32xf32>
    %317 = arith.mulf %312, %316 : vector<2x32xf32>
    %c12_71 = arith.constant 12 : index
    %c0_72 = arith.constant 0 : index
    %318 = vector.load %arg13[%c12_71, %c0_72] : memref<16x32xf32, #tpu.memory_space<vmem>>, vector<2x32xf32>
    tpu.vector_store %arg13[%c12_71, %c0_72], %317 {strides = array<i32>} : memref<16x32xf32, #tpu.memory_space<vmem>>, vector<2x32xf32>,
    %319 = vector.extract_strided_slice %176 {offsets = [14, 0], sizes = [2, 128], strides = [1, 1]} : vector<16x128xf32> to vector<2x128xf32>
    %320 = arith.truncf %317 : vector<2x32xf32> to vector<2x32xbf16>
    %cst_73 = arith.constant dense<0.000000e+00> : vector<2x128xf32>
    %321 = tpu.matmul %320, %172, %cst_73 {dimension_numbers = #tpu.dot_dimension_numbers<[1], [0], [0], [1], [0, 0, 1, 1], [], []>} : vector<2x32xbf16>, vector<32x128xbf16>, vector<2x128xf32> -> vector<2x128xf32>
    %322 = arith.addf %319, %321 : vector<2x128xf32>
    %323 = arith.negf %322 : vector<2x128xf32>
    %324 = math.exp %323 : vector<2x128xf32>
    %cst_74 = arith.constant 1.000000e+00 : f32
    %325 = vector.broadcast %cst_74 : f32 to vector<2x128xf32>
    %326 = arith.addf %325, %324 : vector<2x128xf32>
    %327 = arith.divf %325, %326 : vector<2x128xf32>
    %328 = math.tanh %322 : vector<2x128xf32>
    %329 = vector.extract_strided_slice %327 {offsets = [0, 0], sizes = [2, 32], strides = [1, 1]} : vector<2x128xf32> to vector<2x32xf32>
    %330 = vector.extract_strided_slice %327 {offsets = [0, 32], sizes = [2, 32], strides = [1, 1]} : vector<2x128xf32> to vector<2x32xf32>
    %331 = vector.extract_strided_slice %328 {offsets = [0, 64], sizes = [2, 32], strides = [1, 1]} : vector<2x128xf32> to vector<2x32xf32>
    %332 = vector.extract_strided_slice %327 {offsets = [0, 96], sizes = [2, 32], strides = [1, 1]} : vector<2x128xf32> to vector<2x32xf32>
    %333 = arith.mulf %330, %315 : vector<2x32xf32>
    %334 = arith.mulf %329, %331 : vector<2x32xf32>
    %335 = arith.addf %333, %334 : vector<2x32xf32>
    %336 = math.tanh %335 : vector<2x32xf32>
    %337 = arith.mulf %332, %336 : vector<2x32xf32>
    %c14_75 = arith.constant 14 : index
    %c0_76 = arith.constant 0 : index
    %338 = vector.load %arg13[%c14_75, %c0_76] : memref<16x32xf32, #tpu.memory_space<vmem>>, vector<2x32xf32>
    tpu.vector_store %arg13[%c14_75, %c0_76], %337 {strides = array<i32>} : memref<16x32xf32, #tpu.memory_space<vmem>>, vector<2x32xf32>,
    %c0_77 = arith.constant 0 : index
    %c0_78 = arith.constant 0 : index
    %339 = vector.load %arg13[%c0_77, %c0_78] : memref<16x32xf32, #tpu.memory_space<vmem>>, vector<16x32xf32>
    %340 = arith.truncf %339 : vector<16x32xf32> to vector<16x32xbf16>
    %c0_79 = arith.constant 0 : index
    %c0_80 = arith.constant 0 : index
    %341 = vector.load %arg7[%c0_79, %c0_80] : memref<32x32xbf16, #tpu.memory_space<vmem>>, vector<32x32xbf16>
    %cst_81 = arith.constant dense<0.000000e+00> : vector<16x32xf32>
    %342 = tpu.matmul %340, %341, %cst_81 {dimension_numbers = #tpu.dot_dimension_numbers<[1], [0], [0], [1], [0, 0, 1, 1], [], []>} : vector<16x32xbf16>, vector<32x32xbf16>, vector<16x32xf32> -> vector<16x32xf32>
    %c0_82 = arith.constant 0 : index
    %c0_83 = arith.constant 0 : index
    %343 = vector.load %arg8[%c0_82, %c0_83] : memref<1x32xf32, #tpu.memory_space<vmem>>, vector<1x32xf32>
    %344 = vector.broadcast %343 : vector<1x32xf32> to vector<16x32xf32>
    %345 = arith.addf %342, %344 : vector<16x32xf32>
    %346 = math.tanh %345 : vector<16x32xf32>
    %347 = vector.extract_strided_slice %346 {offsets = [0, 0], sizes = [2, 32], strides = [1, 1]} : vector<16x32xf32> to vector<2x32xf32>
    %348 = arith.mulf %347, %337 : vector<2x32xf32>
    %cst_84 = arith.constant dense<0.000000e+00> : vector<2xf32>
    %349 = vector.multi_reduction <add>, %348, %cst_84 [1] : vector<2x32xf32> to vector<2xf32>
    %350 = vector.shape_cast %349 : vector<2xf32> to vector<2x1xf32>
    %351 = vector.extract_strided_slice %346 {offsets = [2, 0], sizes = [2, 32], strides = [1, 1]} : vector<16x32xf32> to vector<2x32xf32>
    %352 = arith.mulf %351, %337 : vector<2x32xf32>
    %cst_85 = arith.constant dense<0.000000e+00> : vector<2xf32>
    %353 = vector.multi_reduction <add>, %352, %cst_85 [1] : vector<2x32xf32> to vector<2xf32>
    %354 = vector.shape_cast %353 : vector<2xf32> to vector<2x1xf32>
    %355 = vector.extract_strided_slice %346 {offsets = [4, 0], sizes = [2, 32], strides = [1, 1]} : vector<16x32xf32> to vector<2x32xf32>
    %356 = arith.mulf %355, %337 : vector<2x32xf32>
    %cst_86 = arith.constant dense<0.000000e+00> : vector<2xf32>
    %357 = vector.multi_reduction <add>, %356, %cst_86 [1] : vector<2x32xf32> to vector<2xf32>
    %358 = vector.shape_cast %357 : vector<2xf32> to vector<2x1xf32>
    %359 = vector.extract_strided_slice %346 {offsets = [6, 0], sizes = [2, 32], strides = [1, 1]} : vector<16x32xf32> to vector<2x32xf32>
    %360 = arith.mulf %359, %337 : vector<2x32xf32>
    %cst_87 = arith.constant dense<0.000000e+00> : vector<2xf32>
    %361 = vector.multi_reduction <add>, %360, %cst_87 [1] : vector<2x32xf32> to vector<2xf32>
    %362 = vector.shape_cast %361 : vector<2xf32> to vector<2x1xf32>
    %363 = vector.extract_strided_slice %346 {offsets = [8, 0], sizes = [2, 32], strides = [1, 1]} : vector<16x32xf32> to vector<2x32xf32>
    %364 = arith.mulf %363, %337 : vector<2x32xf32>
    %cst_88 = arith.constant dense<0.000000e+00> : vector<2xf32>
    %365 = vector.multi_reduction <add>, %364, %cst_88 [1] : vector<2x32xf32> to vector<2xf32>
    %366 = vector.shape_cast %365 : vector<2xf32> to vector<2x1xf32>
    %367 = vector.extract_strided_slice %346 {offsets = [10, 0], sizes = [2, 32], strides = [1, 1]} : vector<16x32xf32> to vector<2x32xf32>
    %368 = arith.mulf %367, %337 : vector<2x32xf32>
    %cst_89 = arith.constant dense<0.000000e+00> : vector<2xf32>
    %369 = vector.multi_reduction <add>, %368, %cst_89 [1] : vector<2x32xf32> to vector<2xf32>
    %370 = vector.shape_cast %369 : vector<2xf32> to vector<2x1xf32>
    %371 = vector.extract_strided_slice %346 {offsets = [12, 0], sizes = [2, 32], strides = [1, 1]} : vector<16x32xf32> to vector<2x32xf32>
    %372 = arith.mulf %371, %337 : vector<2x32xf32>
    %cst_90 = arith.constant dense<0.000000e+00> : vector<2xf32>
    %373 = vector.multi_reduction <add>, %372, %cst_90 [1] : vector<2x32xf32> to vector<2xf32>
    %374 = vector.shape_cast %373 : vector<2xf32> to vector<2x1xf32>
    %375 = vector.extract_strided_slice %346 {offsets = [14, 0], sizes = [2, 32], strides = [1, 1]} : vector<16x32xf32> to vector<2x32xf32>
    %376 = arith.mulf %375, %337 : vector<2x32xf32>
    %cst_91 = arith.constant dense<0.000000e+00> : vector<2xf32>
    %377 = vector.multi_reduction <add>, %376, %cst_91 [1] : vector<2x32xf32> to vector<2xf32>
    %378 = vector.shape_cast %377 : vector<2xf32> to vector<2x1xf32>
    %379 = arith.maximumf %350, %354 : vector<2x1xf32>
    %380 = arith.maximumf %379, %358 : vector<2x1xf32>
    %381 = arith.maximumf %380, %362 : vector<2x1xf32>
    %382 = arith.maximumf %381, %366 : vector<2x1xf32>
    %383 = arith.maximumf %382, %370 : vector<2x1xf32>
    %384 = arith.maximumf %383, %374 : vector<2x1xf32>
    %385 = arith.maximumf %384, %378 : vector<2x1xf32>
    %386 = arith.subf %350, %385 : vector<2x1xf32>
    %387 = math.exp %386 : vector<2x1xf32>
    %388 = arith.subf %354, %385 : vector<2x1xf32>
    %389 = math.exp %388 : vector<2x1xf32>
    %390 = arith.subf %358, %385 : vector<2x1xf32>
    %391 = math.exp %390 : vector<2x1xf32>
    %392 = arith.subf %362, %385 : vector<2x1xf32>
    %393 = math.exp %392 : vector<2x1xf32>
    %394 = arith.subf %366, %385 : vector<2x1xf32>
    %395 = math.exp %394 : vector<2x1xf32>
    %396 = arith.subf %370, %385 : vector<2x1xf32>
    %397 = math.exp %396 : vector<2x1xf32>
    %398 = arith.subf %374, %385 : vector<2x1xf32>
    %399 = math.exp %398 : vector<2x1xf32>
    %400 = arith.subf %378, %385 : vector<2x1xf32>
    %401 = math.exp %400 : vector<2x1xf32>
    %402 = arith.addf %387, %389 : vector<2x1xf32>
    %403 = arith.addf %402, %391 : vector<2x1xf32>
    %404 = arith.addf %403, %393 : vector<2x1xf32>
    %405 = arith.addf %404, %395 : vector<2x1xf32>
    %406 = arith.addf %405, %397 : vector<2x1xf32>
    %407 = arith.addf %406, %399 : vector<2x1xf32>
    %408 = arith.addf %407, %401 : vector<2x1xf32>
    %cst_92 = arith.constant 1.000000e+00 : f32
    %409 = vector.broadcast %cst_92 : f32 to vector<2x1xf32>
    %410 = arith.divf %409, %408 : vector<2x1xf32>
    %411 = arith.mulf %387, %410 : vector<2x1xf32>
    %412 = arith.mulf %389, %410 : vector<2x1xf32>
    %413 = arith.mulf %391, %410 : vector<2x1xf32>
    %414 = arith.mulf %393, %410 : vector<2x1xf32>
    %415 = arith.mulf %395, %410 : vector<2x1xf32>
    %416 = arith.mulf %397, %410 : vector<2x1xf32>
    %417 = arith.mulf %399, %410 : vector<2x1xf32>
    %418 = arith.mulf %401, %410 : vector<2x1xf32>
    %419 = vector.broadcast %411 : vector<2x1xf32> to vector<2x32xf32>
    %420 = arith.mulf %419, %197 : vector<2x32xf32>
    %421 = vector.broadcast %412 : vector<2x1xf32> to vector<2x32xf32>
    %422 = arith.mulf %421, %217 : vector<2x32xf32>
    %423 = arith.addf %420, %422 : vector<2x32xf32>
    %424 = vector.broadcast %413 : vector<2x1xf32> to vector<2x32xf32>
    %425 = arith.mulf %424, %237 : vector<2x32xf32>
    %426 = arith.addf %423, %425 : vector<2x32xf32>
    %427 = vector.broadcast %414 : vector<2x1xf32> to vector<2x32xf32>
    %428 = arith.mulf %427, %257 : vector<2x32xf32>
    %429 = arith.addf %426, %428 : vector<2x32xf32>
    %430 = vector.broadcast %415 : vector<2x1xf32> to vector<2x32xf32>
    %431 = arith.mulf %430, %277 : vector<2x32xf32>
    %432 = arith.addf %429, %431 : vector<2x32xf32>
    %433 = vector.broadcast %416 : vector<2x1xf32> to vector<2x32xf32>
    %434 = arith.mulf %433, %297 : vector<2x32xf32>
    %435 = arith.addf %432, %434 : vector<2x32xf32>
    %436 = vector.broadcast %417 : vector<2x1xf32> to vector<2x32xf32>
    %437 = arith.mulf %436, %317 : vector<2x32xf32>
    %438 = arith.addf %435, %437 : vector<2x32xf32>
    %439 = vector.broadcast %418 : vector<2x1xf32> to vector<2x32xf32>
    %440 = arith.mulf %439, %337 : vector<2x32xf32>
    %441 = arith.addf %438, %440 : vector<2x32xf32>
    %442 = tpu.iota {dimensions = array<i32: 1>} : vector<2x8xi32>
    %cst_93 = arith.constant 0.000000e+00 : f32
    %443 = vector.broadcast %cst_93 : f32 to vector<2x8xf32>
    %c0_i32 = arith.constant 0 : i32
    %444 = vector.broadcast %c0_i32 : i32 to vector<2x8xi32>
    %445 = arith.cmpi eq, %442, %444 : vector<2x8xi32>
    %cst_94 = arith.constant 0.000000e+00 : f32
    %446 = vector.shape_cast %411 : vector<2x1xf32> to vector<2x1xf32>
    %447 = vector.broadcast %446 : vector<2x1xf32> to vector<2x8xf32>
    %448 = vector.broadcast %cst_94 : f32 to vector<2x8xf32>
    %449 = arith.select %445, %447, %448 : vector<2x8xi1>, vector<2x8xf32>
    %450 = arith.addf %443, %449 : vector<2x8xf32>
    %c1_i32 = arith.constant 1 : i32
    %451 = vector.broadcast %c1_i32 : i32 to vector<2x8xi32>
    %452 = arith.cmpi eq, %442, %451 : vector<2x8xi32>
    %cst_95 = arith.constant 0.000000e+00 : f32
    %453 = vector.shape_cast %412 : vector<2x1xf32> to vector<2x1xf32>
    %454 = vector.broadcast %453 : vector<2x1xf32> to vector<2x8xf32>
    %455 = vector.broadcast %cst_95 : f32 to vector<2x8xf32>
    %456 = arith.select %452, %454, %455 : vector<2x8xi1>, vector<2x8xf32>
    %457 = arith.addf %450, %456 : vector<2x8xf32>
    %c2_i32 = arith.constant 2 : i32
    %458 = vector.broadcast %c2_i32 : i32 to vector<2x8xi32>
    %459 = arith.cmpi eq, %442, %458 : vector<2x8xi32>
    %cst_96 = arith.constant 0.000000e+00 : f32
    %460 = vector.shape_cast %413 : vector<2x1xf32> to vector<2x1xf32>
    %461 = vector.broadcast %460 : vector<2x1xf32> to vector<2x8xf32>
    %462 = vector.broadcast %cst_96 : f32 to vector<2x8xf32>
    %463 = arith.select %459, %461, %462 : vector<2x8xi1>, vector<2x8xf32>
    %464 = arith.addf %457, %463 : vector<2x8xf32>
    %c3_i32 = arith.constant 3 : i32
    %465 = vector.broadcast %c3_i32 : i32 to vector<2x8xi32>
    %466 = arith.cmpi eq, %442, %465 : vector<2x8xi32>
    %cst_97 = arith.constant 0.000000e+00 : f32
    %467 = vector.shape_cast %414 : vector<2x1xf32> to vector<2x1xf32>
    %468 = vector.broadcast %467 : vector<2x1xf32> to vector<2x8xf32>
    %469 = vector.broadcast %cst_97 : f32 to vector<2x8xf32>
    %470 = arith.select %466, %468, %469 : vector<2x8xi1>, vector<2x8xf32>
    %471 = arith.addf %464, %470 : vector<2x8xf32>
    %c4_i32 = arith.constant 4 : i32
    %472 = vector.broadcast %c4_i32 : i32 to vector<2x8xi32>
    %473 = arith.cmpi eq, %442, %472 : vector<2x8xi32>
    %cst_98 = arith.constant 0.000000e+00 : f32
    %474 = vector.shape_cast %415 : vector<2x1xf32> to vector<2x1xf32>
    %475 = vector.broadcast %474 : vector<2x1xf32> to vector<2x8xf32>
    %476 = vector.broadcast %cst_98 : f32 to vector<2x8xf32>
    %477 = arith.select %473, %475, %476 : vector<2x8xi1>, vector<2x8xf32>
    %478 = arith.addf %471, %477 : vector<2x8xf32>
    %c5_i32 = arith.constant 5 : i32
    %479 = vector.broadcast %c5_i32 : i32 to vector<2x8xi32>
    %480 = arith.cmpi eq, %442, %479 : vector<2x8xi32>
    %cst_99 = arith.constant 0.000000e+00 : f32
    %481 = vector.shape_cast %416 : vector<2x1xf32> to vector<2x1xf32>
    %482 = vector.broadcast %481 : vector<2x1xf32> to vector<2x8xf32>
    %483 = vector.broadcast %cst_99 : f32 to vector<2x8xf32>
    %484 = arith.select %480, %482, %483 : vector<2x8xi1>, vector<2x8xf32>
    %485 = arith.addf %478, %484 : vector<2x8xf32>
    %c6_i32 = arith.constant 6 : i32
    %486 = vector.broadcast %c6_i32 : i32 to vector<2x8xi32>
    %487 = arith.cmpi eq, %442, %486 : vector<2x8xi32>
    %cst_100 = arith.constant 0.000000e+00 : f32
    %488 = vector.shape_cast %417 : vector<2x1xf32> to vector<2x1xf32>
    %489 = vector.broadcast %488 : vector<2x1xf32> to vector<2x8xf32>
    %490 = vector.broadcast %cst_100 : f32 to vector<2x8xf32>
    %491 = arith.select %487, %489, %490 : vector<2x8xi1>, vector<2x8xf32>
    %492 = arith.addf %485, %491 : vector<2x8xf32>
    %c7_i32 = arith.constant 7 : i32
    %493 = vector.broadcast %c7_i32 : i32 to vector<2x8xi32>
    %494 = arith.cmpi eq, %442, %493 : vector<2x8xi32>
    %cst_101 = arith.constant 0.000000e+00 : f32
    %495 = vector.shape_cast %418 : vector<2x1xf32> to vector<2x1xf32>
    %496 = vector.broadcast %495 : vector<2x1xf32> to vector<2x8xf32>
    %497 = vector.broadcast %cst_101 : f32 to vector<2x8xf32>
    %498 = arith.select %494, %496, %497 : vector<2x8xi1>, vector<2x8xf32>
    %499 = arith.addf %492, %498 : vector<2x8xf32>
    %c0_102 = arith.constant 0 : index
    %c0_103 = arith.constant 0 : index
    %500 = vector.load %arg12[%c0_102, %c0_103] : memref<2x8xf32, #tpu.memory_space<vmem>>, vector<2x8xf32>
    tpu.vector_store %arg12[%c0_102, %c0_103], %499 {strides = array<i32>} : memref<2x8xf32, #tpu.memory_space<vmem>>, vector<2x8xf32>,
    %501 = arith.truncf %441 : vector<2x32xf32> to vector<2x32xbf16>
    %c0_104 = arith.constant 0 : index
    %c0_105 = arith.constant 0 : index
    %502 = vector.load %arg9[%c0_104, %c0_105] : memref<32x128xbf16, #tpu.memory_space<vmem>>, vector<32x128xbf16>
    %cst_106 = arith.constant dense<0.000000e+00> : vector<2x128xf32>
    %503 = tpu.matmul %501, %502, %cst_106 {dimension_numbers = #tpu.dot_dimension_numbers<[1], [0], [0], [1], [0, 0, 1, 1], [], []>} : vector<2x32xbf16>, vector<32x128xbf16>, vector<2x128xf32> -> vector<2x128xf32>
    %c0_107 = arith.constant 0 : index
    %c0_108 = arith.constant 0 : index
    %504 = vector.load %arg10[%c0_107, %c0_108] : memref<1x128xf32, #tpu.memory_space<vmem>>, vector<1x128xf32>
    %505 = vector.broadcast %504 : vector<1x128xf32> to vector<2x128xf32>
    %506 = arith.addf %503, %505 : vector<2x128xf32>
    %c0_109 = arith.constant 0 : index
    %c0_110 = arith.constant 0 : index
    %507 = vector.load %arg11[%c0_109, %c0_110] : memref<2x128xf32, #tpu.memory_space<vmem>>, vector<2x128xf32>
    tpu.vector_store %arg11[%c0_109, %c0_110], %506 {strides = array<i32>} : memref<2x128xf32, #tpu.memory_space<vmem>>, vector<2x128xf32>,
    return
  }
}

</mosaic_0001>

<bundles_post_ra>
// kernel: forward.1
= control target key start
LH: loop header
LB: loop body
LE: loop exit
PB: predicated region body
PF: predicated region fallthrough
CT: control target
= control target key end

     0   :  { %18 = vsyncpa [#allocation4], 0  ;;  %v1951_v3 = vmov 0   ;;  %s2318_s0 = inlined_call_operand.vmem [shape: bf16[16,32], index: 0, kind: input, shape index: {}]   ;;  %s2319_s1 = inlined_call_operand.vmem [shape: bf16[32,128], index: 1, kind: input, shape index: {}]   ;;  %s2320_s2 = inlined_call_operand.vmem [shape: bf16[32,128], index: 2, kind: input, shape index: {}]   ;;  %s2321_s3 = inlined_call_operand.vmem [shape: f32[1,128], index: 3, kind: input, shape index: {}]   ;;  %s2322_s4 = inlined_call_operand.vmem [shape: bf16[32,128], index: 4, kind: input, shape index: {}]   ;;  %s2323_s5 = inlined_call_operand.vmem [shape: bf16[32,128], index: 5, kind: input, shape index: {}]   ;;  %s2324_s6 = inlined_call_operand.vmem [shape: f32[1,128], index: 6, kind: input, shape index: {}]   ;;  %s2325_s7 = inlined_call_operand.vmem [shape: bf16[32,32], index: 7, kind: input, shape index: {}]   ;;  %s2326_s8 = inlined_call_operand.vmem [shape: f32[1,32], index: 8, kind: input, shape index: {}]   ;;  %s2327_s9 = inlined_call_operand.vmem [shape: bf16[32,128], index: 9, kind: input, shape index: {}]   ;;  %s2328_s10 = inlined_call_operand.vmem [shape: f32[1,128], index: 10, kind: input, shape index: {}]   ;;  %s2329_s11 = inlined_call_operand.hbm [shape: f32[2,128], index: 11, kind: output, shape index: {0}]   ;;  %s2330_s12 = inlined_call_operand.hbm [shape: f32[2,8], index: 12, kind: output, shape index: {1}]  }
   0x1   :  { %v1726_v0 = vld [vmem:[%s2319_s1 + $0x8] sm:$0xff]  ;;  %v1725_v2 = vld [vmem:[%s2319_s1] sm:$0xff]  ;;  %1742 = vset.pattern.permute.xlu2 %v1951_v3  ;;  %1744 = vset.pattern.permute.xlu0 %v1951_v3 }
   0x2   :  { %v1728_v1 = vld [vmem:[%s2320_s2 + $0x8] sm:$0xff]  ;;  %84 = vmatpush.bf16.msra.mxu0 %v1726_v0  ;;  %v1727_v4 = vld [vmem:[%s2320_s2] sm:$0xff] }
   0x3   :  { %113 = vmatpush.bf16.msra.mxu1 %v1728_v1  ;;  %177 = vmatpush.bf16.msra.mxu2 %v1728_v1 }
   0x4   :  { %248 = vmatpush.bf16.msra.mxu3 %v1728_v1 }
   0x5   :  { %19 = vsyncpa [#allocation6], 0  ;;  %1743 = vset.pattern.permute.xlu1 %v1951_v3  ;;  %v1724_v5 = vld [vmem:[%s2318_s0] sm:$0xff]  ;;  %vm74_vm0 = vcmask 261120   ;;  %s1952_s2 = smov 64   ;;  %s1624_s0 = sshll.u32 %s2330_s12, 4  ;;  %s1625_s0 = int_to_ptr.hbm [resolvable:$true] %s1624_s0 }
   0x6   :  { %85 = vmatpush.bf16.msra.mxu0 %v1725_v2  ;;  %v2044_v6 = vld [vmem:[%s2321_s3] ss:$0 sm:$0xff]  ;;  %s1953_s3 = smov 32   ;;  %s1955_s13 = smov [#allocation3]  }
   0x7   :  { %114 = vmatpush.bf16.msra.mxu1 %v1727_v4  ;;  %178 = vmatpush.bf16.msra.mxu2 %v1727_v4  ;;  %s1611_s14 = sshll.u32 %s1955_s13, 4  ;;  %s1613_s16 = sshll.u32 %s2329_s11, 4  ;;  %s1612_s14 = int_to_ptr.vmem [resolvable:$true] %s1611_s14  ;;  %s1614_s16 = int_to_ptr.hbm [resolvable:$true] %s1613_s16 }
   0x8   :  { %249 = vmatpush.bf16.msra.mxu3 %v1727_v4 }
   0x9   :  { %1650 = vmatmul.msk.bf16.vlgmr.msra.gmra.mxu0 %vm74_vm0, %v1724_v5 }
   0xa   :  { %319 = vmatpush.bf16.msrb.mxu0 %v1728_v1  ;;  %115 = vmatmul.bf16.vlgmr.msra.gmra.mxu1 %v1951_v3 }
   0xb   :  { %390 = vmatpush.bf16.msrb.mxu1 %v1728_v1  ;;  %456 = vmatpush.bf16.msrb.mxu2 %v1728_v1 }
   0xc   :  { %526 = vmatpush.bf16.msrb.mxu3 %v1728_v1 }
   0xe   :  { %320 = vmatpush.bf16.msrb.mxu0 %v1727_v4 }
   0xf   :  { %391 = vmatpush.bf16.msrb.mxu1 %v1727_v4  ;;  %457 = vmatpush.bf16.msrb.mxu2 %v1727_v4 }
  0x10   :  { %527 = vmatpush.bf16.msrb.mxu3 %v1727_v4 }
  0x12   :  { %596 = vmatpush.bf16.msra.mxu0 %v1728_v1 }
  0x16   :  { %597 = vmatpush.bf16.msra.mxu0 %v1727_v4 }
  0x86   :  { %v87_v7 = vpop.f32.mrf.mxu0 }
  0x87   :  { %v116_v8 = vpop.f32.mrf.mxu1  ;;  %v2047_v9 = vadd.f32 %v2044_v6, %v87_v7 }
  0x89   :  { %v120_v10 = vadd.f32 %v116_v8, %v2047_v9 }
  0x8b   :  { %1749 = vtanh.f32 %v120_v10  ;;  %v1659_v13 = vmul.f32 -1.442695, %v120_v10 }
  0x8d   :  { %1751 = vpow2.f32 %v1659_v13 }
  0x8f   :  { %v118_v11 = vpop.f32.mrf.mxu1 }
  0x91   :  { %v1750_v12 = vpop.eup %1749 }
  0x92   :  { %143 = vrot.lane.b32.xlu0 %v1750_v12, %s1952_s2 }
  0x93   :  { %v1752_v14 = vpop.eup %1751 }
  0x94   :  { %v124_v15 = vadd.f32 1.0, %v1752_v14 }
  0x96   :  { %1753 = vrcp.f32 %v124_v15  ;;  %v136_v21 = vand.u32 2147483648, %v124_v15  ;;  %vm130_vm2 = vweird.f32 %v124_v15  ;;  %v134_v22 = vand.u32 2147483647, %v124_v15 }
  0x98   :  { %v137_v24 = vor.u32 1.1754944e-38, %v136_v21  ;;  %vm135_vm4 = vcmp.eq.f32.partialorder %v134_v22, 8.507059e+37 }
  0x9c   :  { %v1754_v16 = vpop.eup %1753 }
  0x9d   :  { %v126_v17 = vmul.f32 %v1754_v16, %v124_v15  ;;  %vm131_vm1 = vweird.f32 %v1754_v16 }
  0x9e   :  { %vm132_vm3 = vmor %vm130_vm2, %vm131_vm1 }
  0x9f   :  { %v127_v18 = vsub.f32 1.0, %v126_v17 }
  0xa1   :  { %v128_v19 = vmul.f32 %v1754_v16, %v127_v18 }
  0xa3   :  { %v129_v20 = vadd.f32 %v1754_v16, %v128_v19 }
  0xa5   :  { %v133_v23 = vsel %vm132_vm3, %v1754_v16, %v129_v20 }
  0xa6   :  { %v138_v26 = vsel %vm135_vm4, %v137_v24, %v133_v23 }
  0xa7   :  { %v141_v28 = vmul.f32 0.0, %v138_v26 }
 0x104   :  { %v144_v25 = vpop.permute.xlu0 %143 }
 0x105   :  { %v146_v27 = vmul.f32 %v144_v25, %v138_v26 }
 0x107   :  { %148 = vrot.lane.b32.xlu0 %v146_v27, %s1953_s3 }
 0x179   :  { %v149_v29 = vpop.permute.xlu0 %148 }
 0x17a   :  { %v151_v30 = vadd.f32 %v149_v29, %v141_v28 }
 0x17c   :  { %1755 = vtanh.f32 %v151_v30  ;;  %v209_v56 = vrot.slane %v151_v30, 6 }
 0x182   :  { %v1756_v31 = vpop.eup %1755 }
 0x183   :  { %154 = vrot.lane.b32.xlu1 %v1756_v31, %s1952_s2 }
 0x1f5   :  { %v155_v32 = vpop.permute.xlu1 %154 }
 0x1f6   :  { %v2053_v33 = vmul.f32 %v155_v32, %v138_v26 }
 0x1f8   :  { %v164_v34 = vpack.c.bf16 %v2053_v33, %v2053_v33 }
 0x1fa   :  { %166 = vrot.lane.b32.xlu1 %v164_v34, %s1953_s3 }
 0x26c   :  { %v167_v35 = vpop.permute.xlu1 %166 }
 0x26d   :  { %1660 = vmatmul.msk.bf16.vlgmr.msra.gmra.mxu2 %vm74_vm0, %v167_v35 }
 0x2f0   :  { %v180_v36 = vpop.f32.mrf.mxu2 }
 0x2f1   :  { %v185_v37 = vrot.slane %v180_v36, 6  ;;  %v89_v36 = vpop.f32.mrf.mxu0 }
 0x2f3   :  { %v187_v38 = vadd.f32 %v185_v37, %v2047_v9 }
 0x2f5   :  { %1757 = vtanh.f32 %v187_v38  ;;  %v1661_v41 = vmul.f32 -1.442695, %v187_v38 }
 0x2f7   :  { %1759 = vpow2.f32 %v1661_v41 }
 0x2f8   :  { %v182_v39 = vpop.f32.mrf.mxu2 }
 0x2fb   :  { %v1758_v40 = vpop.eup %1757 }
 0x2fc   :  { %213 = vrot.lane.b32.xlu2 %v1758_v40, %s1952_s2 }
 0x2fd   :  { %v1760_v42 = vpop.eup %1759 }
 0x2fe   :  { %v191_v43 = vadd.f32 1.0, %v1760_v42 }
 0x300   :  { %1761 = vrcp.f32 %v191_v43  ;;  %v203_v49 = vand.u32 2147483648, %v191_v43  ;;  %vm197_vm6 = vweird.f32 %v191_v43  ;;  %v201_v50 = vand.u32 2147483647, %v191_v43 }
 0x302   :  { %v204_v52 = vor.u32 1.1754944e-38, %v203_v49  ;;  %vm202_vm8 = vcmp.eq.f32.partialorder %v201_v50, 8.507059e+37 }
 0x306   :  { %v1762_v44 = vpop.eup %1761 }
 0x307   :  { %v193_v45 = vmul.f32 %v1762_v44, %v191_v43  ;;  %vm198_vm5 = vweird.f32 %v1762_v44 }
 0x308   :  { %vm199_vm7 = vmor %vm197_vm6, %vm198_vm5 }
 0x309   :  { %v194_v46 = vsub.f32 1.0, %v193_v45 }
 0x30b   :  { %v195_v47 = vmul.f32 %v1762_v44, %v194_v46 }
 0x30d   :  { %v196_v48 = vadd.f32 %v1762_v44, %v195_v47 }
 0x30f   :  { %v200_v51 = vsel %vm199_vm7, %v1762_v44, %v196_v48 }
 0x310   :  { %v205_v54 = vsel %vm202_vm8, %v204_v52, %v200_v51 }
 0x311   :  { %v211_v57 = vmul.f32 %v209_v56, %v205_v54 }
 0x356   :  { %v214_v53 = vpop.permute.xlu2 %213 }
 0x357   :  { %v216_v55 = vmul.f32 %v214_v53, %v205_v54 }
 0x359   :  { %218 = vrot.lane.b32.xlu2 %v216_v55, %s1953_s3 }
 0x3b3   :  { %v219_v58 = vpop.permute.xlu2 %218 }
 0x3b4   :  { %v221_v59 = vadd.f32 %v219_v58, %v211_v57 }
 0x3b6   :  { %1763 = vtanh.f32 %v221_v59  ;;  %v280_v25 = vrot.slane %v221_v59, 6 }
 0x3bc   :  { %v1764_v60 = vpop.eup %1763 }
 0x3bd   :  { %224 = vrot.lane.b32.xlu0 %v1764_v60, %s1952_s2 }
 0x42f   :  { %v225_v61 = vpop.permute.xlu0 %224 }
 0x430   :  { %v2063_v62 = vmul.f32 %v225_v61, %v205_v54 }
 0x432   :  { %v234_v63 = vpack.c.bf16 %v2063_v62, %v2063_v62 }
 0x434   :  { %v236_v0 = vrot.slane %v234_v63, 1 }
 0x436   :  { %237 = vrot.lane.b32.xlu1 %v236_v0, %s1953_s3 }
 0x4a8   :  { %v238_v1 = vpop.permute.xlu1 %237 }
 0x4a9   :  { %1662 = vmatmul.msk.bf16.vlgmr.msra.gmra.mxu3 %vm74_vm0, %v238_v1 }
 0x52c   :  { %v251_v2 = vpop.f32.mrf.mxu3 }
 0x52d   :  { %v256_v4 = vrot.slane %v251_v2, 4 }
 0x52f   :  { %v258_v5 = vadd.f32 %v256_v4, %v2047_v9  ;;  %v2090_v4 = vadd.f32 %v2044_v6, %v89_v36 }
 0x531   :  { %1765 = vtanh.f32 %v258_v5  ;;  %v1663_v10 = vmul.f32 -1.442695, %v258_v5 }
 0x533   :  { %1767 = vpow2.f32 %v1663_v10 }
 0x534   :  { %v253_v7 = vpop.f32.mrf.mxu3 }
 0x537   :  { %v1766_v8 = vpop.eup %1765 }
 0x538   :  { %284 = vrot.lane.b32.xlu2 %v1766_v8, %s1952_s2 }
 0x539   :  { %v1768_v11 = vpop.eup %1767 }
 0x53a   :  { %v262_v12 = vadd.f32 1.0, %v1768_v11 }
 0x53c   :  { %1769 = vrcp.f32 %v262_v12  ;;  %v274_v18 = vand.u32 2147483648, %v262_v12  ;;  %vm268_vm10 = vweird.f32 %v262_v12  ;;  %v272_v19 = vand.u32 2147483647, %v262_v12 }
 0x53e   :  { %v275_v21 = vor.u32 1.1754944e-38, %v274_v18  ;;  %vm273_vm12 = vcmp.eq.f32.partialorder %v272_v19, 8.507059e+37 }
 0x542   :  { %v1770_v13 = vpop.eup %1769 }
 0x543   :  { %v264_v14 = vmul.f32 %v1770_v13, %v262_v12  ;;  %vm269_vm9 = vweird.f32 %v1770_v13 }
 0x544   :  { %vm270_vm11 = vmor %vm268_vm10, %vm269_vm9 }
 0x545   :  { %v265_v15 = vsub.f32 1.0, %v264_v14 }
 0x547   :  { %v266_v16 = vmul.f32 %v1770_v13, %v265_v15 }
 0x549   :  { %v267_v17 = vadd.f32 %v1770_v13, %v266_v16 }
 0x54b   :  { %v271_v20 = vsel %vm270_vm11, %v1770_v13, %v267_v17 }
 0x54c   :  { %v276_v23 = vsel %vm273_vm12, %v275_v21, %v271_v20 }
 0x54d   :  { %v282_v26 = vmul.f32 %v280_v25, %v276_v23 }
 0x592   :  { %v285_v22 = vpop.permute.xlu2 %284 }
 0x593   :  { %v287_v24 = vmul.f32 %v285_v22, %v276_v23 }
 0x595   :  { %289 = vrot.lane.b32.xlu0 %v287_v24, %s1953_s3 }
 0x607   :  { %v290_v27 = vpop.permute.xlu0 %289 }
 0x608   :  { %v292_v28 = vadd.f32 %v290_v27, %v282_v26 }
 0x60a   :  { %1771 = vtanh.f32 %v292_v28  ;;  %v351_v56 = vrot.slane %v292_v28, 6 }
 0x610   :  { %v1772_v29 = vpop.eup %1771 }
 0x611   :  { %295 = vrot.lane.b32.xlu1 %v1772_v29, %s1952_s2 }
 0x683   :  { %v296_v30 = vpop.permute.xlu1 %295 }
 0x684   :  { %v2073_v31 = vmul.f32 %v296_v30, %v276_v23 }
 0x686   :  { %v305_v32 = vpack.c.bf16 %v2073_v31, %v2073_v31 }
 0x688   :  { %v307_v34 = vrot.slane %v305_v32, 2 }
 0x68a   :  { %308 = vrot.lane.b32.xlu2 %v307_v34, %s1953_s3 }
 0x6e4   :  { %v309_v35 = vpop.permute.xlu2 %308 }
 0x6e5   :  { %1664 = vmatmul.msk.bf16.vlgmr.msrb.gmra.mxu0 %vm74_vm0, %v309_v35 }
 0x762   :  { %v322_v37 = vpop.f32.mrf.mxu0 }
 0x763   :  { %v327_v38 = vrot.slane %v322_v37, 2 }
 0x765   :  { %v329_v39 = vadd.f32 %v327_v38, %v2047_v9 }
 0x767   :  { %1773 = vtanh.f32 %v329_v39  ;;  %v1665_v42 = vmul.f32 -1.442695, %v329_v39 }
 0x769   :  { %1775 = vpow2.f32 %v1665_v42 }
 0x76a   :  { %v324_v40 = vpop.f32.mrf.mxu0 }
 0x76d   :  { %v1774_v41 = vpop.eup %1773 }
 0x76e   :  { %355 = vrot.lane.b32.xlu0 %v1774_v41, %s1952_s2 }
 0x76f   :  { %v1776_v43 = vpop.eup %1775 }
 0x770   :  { %v333_v44 = vadd.f32 1.0, %v1776_v43 }
 0x772   :  { %1777 = vrcp.f32 %v333_v44  ;;  %v345_v50 = vand.u32 2147483648, %v333_v44  ;;  %vm339_vm14 = vweird.f32 %v333_v44  ;;  %v343_v51 = vand.u32 2147483647, %v333_v44 }
 0x774   :  { %v346_v52 = vor.u32 1.1754944e-38, %v345_v50  ;;  %vm344_vm1 = vcmp.eq.f32.partialorder %v343_v51, 8.507059e+37 }
 0x778   :  { %v1778_v45 = vpop.eup %1777 }
 0x779   :  { %v335_v46 = vmul.f32 %v1778_v45, %v333_v44  ;;  %vm340_vm13 = vweird.f32 %v1778_v45 }
 0x77a   :  { %vm341_vm15 = vmor %vm339_vm14, %vm340_vm13 }
 0x77b   :  { %v336_v47 = vsub.f32 1.0, %v335_v46 }
 0x77d   :  { %v337_v48 = vmul.f32 %v1778_v45, %v336_v47 }
 0x77f   :  { %v338_v49 = vadd.f32 %v1778_v45, %v337_v48 }
 0x781   :  { %v342_v9 = vsel %vm341_vm15, %v1778_v45, %v338_v49 }
 0x782   :  { %v347_v54 = vsel %vm344_vm1, %v346_v52, %v342_v9 }
 0x783   :  { %v353_v57 = vmul.f32 %v351_v56, %v347_v54 }
 0x7e0   :  { %v356_v53 = vpop.permute.xlu0 %355 }
 0x7e1   :  { %v358_v55 = vmul.f32 %v356_v53, %v347_v54 }
 0x7e3   :  { %360 = vrot.lane.b32.xlu1 %v358_v55, %s1953_s3 }
 0x855   :  { %v361_v58 = vpop.permute.xlu1 %360 }
 0x856   :  { %v363_v59 = vadd.f32 %v361_v58, %v353_v57 }
 0x858   :  { %1779 = vtanh.f32 %v363_v59  ;;  %v419_v25 = vrot.slane %v363_v59, 6 }
 0x85e   :  { %v1780_v60 = vpop.eup %1779 }
 0x85f   :  { %366 = vrot.lane.b32.xlu2 %v1780_v60, %s1952_s2 }
 0x8b9   :  { %v367_v61 = vpop.permute.xlu2 %366 }
 0x8ba   :  { %v2083_v63 = vmul.f32 %v367_v61, %v347_v54 }
 0x8bc   :  { %v376_v0 = vpack.c.bf16 %v2083_v63, %v2083_v63 }
 0x8be   :  { %v378_v1 = vrot.slane %v376_v0, 3 }
 0x8c0   :  { %379 = vrot.lane.b32.xlu0 %v378_v1, %s1953_s3 }
 0x932   :  { %v380_v2 = vpop.permute.xlu0 %379 }
 0x933   :  { %1666 = vmatmul.msk.bf16.vlgmr.msrb.gmra.mxu1 %vm74_vm0, %v380_v2 }
 0x9b0   :  { %v393_v5 = vpop.f32.mrf.mxu1 }
 0x9b1   :  { %v397_v7 = vadd.f32 %v393_v5, %v2090_v4 }
 0x9b3   :  { %1781 = vtanh.f32 %v397_v7  ;;  %v1667_v11 = vmul.f32 -1.442695, %v397_v7 }
 0x9b5   :  { %1783 = vpow2.f32 %v1667_v11 }
 0x9b8   :  { %v395_v8 = vpop.f32.mrf.mxu1 }
 0x9b9   :  { %v1782_v10 = vpop.eup %1781 }
 0x9ba   :  { %423 = vrot.lane.b32.xlu1 %v1782_v10, %s1952_s2 }
 0x9bb   :  { %v1784_v12 = vpop.eup %1783 }
 0x9bc   :  { %v401_v13 = vadd.f32 1.0, %v1784_v12 }
 0x9be   :  { %1785 = vrcp.f32 %v401_v13  ;;  %v413_v6 = vand.u32 2147483648, %v401_v13  ;;  %vm407_vm3 = vweird.f32 %v401_v13  ;;  %v411_v19 = vand.u32 2147483647, %v401_v13 }
 0x9c0   :  { %v414_v21 = vor.u32 1.1754944e-38, %v413_v6  ;;  %vm412_vm5 = vcmp.eq.f32.partialorder %v411_v19, 8.507059e+37 }
 0x9c4   :  { %v1786_v14 = vpop.eup %1785 }
 0x9c5   :  { %v403_v15 = vmul.f32 %v1786_v14, %v401_v13  ;;  %vm408_vm2 = vweird.f32 %v1786_v14 }
 0x9c6   :  { %vm409_vm4 = vmor %vm407_vm3, %vm408_vm2  ;;  %vm162_vm3 = vcmask 254976  }
 0x9c7   :  { %v404_v16 = vsub.f32 1.0, %v403_v15 }
 0x9c9   :  { %v405_v17 = vmul.f32 %v1786_v14, %v404_v16 }
 0x9cb   :  { %v406_v18 = vadd.f32 %v1786_v14, %v405_v17 }
 0x9cd   :  { %v410_v20 = vsel %vm409_vm4, %v1786_v14, %v406_v18  ;;  %vm374_vm4 = vcmask 261126  }
 0x9ce   :  { %v415_v23 = vsel %vm412_vm5, %v414_v21, %v410_v20  ;;  %vm303_vm5 = vcmask 259076  }
 0x9cf   :  { %v421_v26 = vmul.f32 %v419_v25, %v415_v23 }
 0xa2c   :  { %v424_v22 = vpop.permute.xlu1 %423 }
 0xa2d   :  { %v426_v24 = vmul.f32 %v424_v22, %v415_v23 }
 0xa2f   :  { %428 = vrot.lane.b32.xlu2 %v426_v24, %s1953_s3 }
 0xa89   :  { %v429_v27 = vpop.permute.xlu2 %428 }
 0xa8a   :  { %v431_v28 = vadd.f32 %v429_v27, %v421_v26 }
 0xa8c   :  { %1787 = vtanh.f32 %v431_v28  ;;  %v488_v55 = vrot.slane %v431_v28, 6 }
 0xa92   :  { %v1788_v29 = vpop.eup %1787 }
 0xa93   :  { %434 = vrot.lane.b32.xlu0 %v1788_v29, %s1952_s2 }
 0xb05   :  { %v435_v30 = vpop.permute.xlu0 %434 }
 0xb06   :  { %v2096_v32 = vmul.f32 %v435_v30, %v415_v23 }
 0xb08   :  { %v443_v34 = vpack.c.bf16 %v2096_v32, %v2096_v32 }
 0xb0a   :  { %445 = vrot.lane.b32.xlu1 %v443_v34, %s1953_s3 }
 0xb7c   :  { %v446_v35 = vpop.permute.xlu1 %445 }
 0xb7d   :  { %1668 = vmatmul.msk.bf16.vlgmr.msrb.gmra.mxu2 %vm74_vm0, %v446_v35 }
 0xc00   :  { %v459_v36 = vpop.f32.mrf.mxu2 }
 0xc01   :  { %v464_v37 = vrot.slane %v459_v36, 6 }
 0xc03   :  { %v466_v38 = vadd.f32 %v464_v37, %v2090_v4 }
 0xc05   :  { %1789 = vtanh.f32 %v466_v38  ;;  %v1669_v41 = vmul.f32 -1.442695, %v466_v38 }
 0xc07   :  { %1791 = vpow2.f32 %v1669_v41 }
 0xc08   :  { %v461_v39 = vpop.f32.mrf.mxu2 }
 0xc0b   :  { %v1790_v40 = vpop.eup %1789 }
 0xc0c   :  { %492 = vrot.lane.b32.xlu2 %v1790_v40, %s1952_s2 }
 0xc0d   :  { %v1792_v42 = vpop.eup %1791 }
 0xc0e   :  { %v470_v43 = vadd.f32 1.0, %v1792_v42 }
 0xc10   :  { %1793 = vrcp.f32 %v470_v43  ;;  %v482_v49 = vand.u32 2147483648, %v470_v43  ;;  %vm476_vm7 = vweird.f32 %v470_v43  ;;  %v480_v50 = vand.u32 2147483647, %v470_v43 }
 0xc12   :  { %v483_v9 = vor.u32 1.1754944e-38, %v482_v49  ;;  %vm481_vm9 = vcmp.eq.f32.partialorder %v480_v50, 8.507059e+37 }
 0xc16   :  { %v1794_v44 = vpop.eup %1793 }
 0xc17   :  { %v472_v45 = vmul.f32 %v1794_v44, %v470_v43  ;;  %vm477_vm6 = vweird.f32 %v1794_v44 }
 0xc18   :  { %vm478_vm8 = vmor %vm476_vm7, %vm477_vm6  ;;  %vm232_vm6 = vcmask 257026  }
 0xc19   :  { %v473_v46 = vsub.f32 1.0, %v472_v45 }
 0xc1b   :  { %v474_v47 = vmul.f32 %v1794_v44, %v473_v46 }
 0xc1d   :  { %v475_v48 = vadd.f32 %v1794_v44, %v474_v47 }
 0xc1f   :  { %v479_v51 = vsel %vm478_vm8, %v1794_v44, %v475_v48 }
 0xc20   :  { %v484_v53 = vsel %vm481_vm9, %v483_v9, %v479_v51 }
 0xc21   :  { %v490_v56 = vmul.f32 %v488_v55, %v484_v53 }
 0xc66   :  { %v493_v52 = vpop.permute.xlu2 %492 }
 0xc67   :  { %v495_v54 = vmul.f32 %v493_v52, %v484_v53 }
 0xc69   :  { %497 = vrot.lane.b32.xlu0 %v495_v54, %s1953_s3 }
 0xcdb   :  { %v498_v57 = vpop.permute.xlu0 %497 }
 0xcdc   :  { %v500_v58 = vadd.f32 %v498_v57, %v490_v56 }
 0xcde   :  { %1795 = vtanh.f32 %v500_v58  ;;  %v558_v26 = vrot.slane %v500_v58, 6 }
 0xce4   :  { %v1796_v59 = vpop.eup %1795 }
 0xce5   :  { %503 = vrot.lane.b32.xlu1 %v1796_v59, %s1952_s2 }
 0xd57   :  { %v504_v60 = vpop.permute.xlu1 %503 }
 0xd58   :  { %v2106_v61 = vmul.f32 %v504_v60, %v484_v53 }
 0xd5a   :  { %v512_v0 = vpack.c.bf16 %v2106_v61, %v2106_v61 }
 0xd5c   :  { %v514_v1 = vrot.slane %v512_v0, 1 }
 0xd5e   :  { %515 = vrot.lane.b32.xlu2 %v514_v1, %s1953_s3 }
 0xdb8   :  { %v516_v2 = vpop.permute.xlu2 %515 }
 0xdb9   :  { %1670 = vmatmul.msk.bf16.vlgmr.msrb.gmra.mxu3 %vm74_vm0, %v516_v2 }
 0xe3c   :  { %v529_v5 = vpop.f32.mrf.mxu3 }
 0xe3d   :  { %v534_v7 = vrot.slane %v529_v5, 4  ;;  %v1730_v5 = vld [vmem:[%s2322_s4 + $0x8] sm:$0xff] }
 0xe3e   :  { %688 = vmatpush.bf16.msra.mxu1 %v1730_v5 }
 0xe3f   :  { %v536_v8 = vadd.f32 %v534_v7, %v2090_v4  ;;  %v1731_v7 = vld [vmem:[%s2323_s5] sm:$0xff] }
 0xe41   :  { %1797 = vtanh.f32 %v536_v8  ;;  %v1671_v12 = vmul.f32 -1.442695, %v536_v8 }
 0xe43   :  { %1799 = vpow2.f32 %v1671_v12 }
 0xe44   :  { %v531_v10 = vpop.f32.mrf.mxu3 }
 0xe47   :  { %v1798_v11 = vpop.eup %1797 }
 0xe48   :  { %562 = vrot.lane.b32.xlu0 %v1798_v11, %s1952_s2  ;;  %v1729_v11 = vld [vmem:[%s2322_s4] sm:$0xff] }
 0xe49   :  { %v1800_v13 = vpop.eup %1799  ;;  %689 = vmatpush.bf16.msra.mxu1 %v1729_v11 }
 0xe4a   :  { %v540_v14 = vadd.f32 1.0, %v1800_v13 }
 0xe4c   :  { %1801 = vrcp.f32 %v540_v14  ;;  %v552_v19 = vand.u32 2147483648, %v540_v14  ;;  %vm546_vm11 = vweird.f32 %v540_v14  ;;  %v550_v20 = vand.u32 2147483647, %v540_v14 }
 0xe4e   :  { %v553_v22 = vor.u32 1.1754944e-38, %v552_v19  ;;  %vm551_vm13 = vcmp.eq.f32.partialorder %v550_v20, 8.507059e+37 }
 0xe52   :  { %v1802_v15 = vpop.eup %1801 }
 0xe53   :  { %v542_v16 = vmul.f32 %v1802_v15, %v540_v14  ;;  %vm547_vm10 = vweird.f32 %v1802_v15 }
 0xe54   :  { %vm548_vm12 = vmor %vm546_vm11, %vm547_vm10 }
 0xe55   :  { %v543_v17 = vsub.f32 1.0, %v542_v16 }
 0xe57   :  { %v544_v18 = vmul.f32 %v1802_v15, %v543_v17  ;;  %v2161_v17 = vld [vmem:[%s2324_s6] ss:$0 sm:$0xff] }
 0xe59   :  { %v545_v6 = vadd.f32 %v1802_v15, %v544_v18 }
 0xe5b   :  { %v549_v21 = vsel %vm548_vm12, %v1802_v15, %v545_v6 }
 0xe5c   :  { %v554_v24 = vsel %vm551_vm13, %v553_v22, %v549_v21 }
 0xe5d   :  { %v560_v27 = vmul.f32 %v558_v26, %v554_v24 }
 0xeba   :  { %v563_v23 = vpop.permute.xlu0 %562 }
 0xebb   :  { %v565_v25 = vmul.f32 %v563_v23, %v554_v24 }
 0xebd   :  { %567 = vrot.lane.b32.xlu1 %v565_v25, %s1953_s3 }
 0xf2f   :  { %v568_v28 = vpop.permute.xlu1 %567 }
 0xf30   :  { %v570_v29 = vadd.f32 %v568_v28, %v560_v27 }
 0xf32   :  { %1803 = vtanh.f32 %v570_v29  ;;  %v628_v58 = vrot.slane %v570_v29, 6 }
 0xf38   :  { %v1804_v30 = vpop.eup %1803 }
 0xf39   :  { %573 = vrot.lane.b32.xlu2 %v1804_v30, %s1952_s2 }
 0xf93   :  { %v574_v34 = vpop.permute.xlu2 %573 }
 0xf94   :  { %v576_v35 = vmul.f32 %v574_v34, %v554_v24 }
 0xf96   :  { %v582_v36 = vpack.c.bf16 %v576_v35, %v576_v35 }
 0xf98   :  { %v584_v37 = vrot.slane %v582_v36, 2 }
 0xf9a   :  { %585 = vrot.lane.b32.xlu0 %v584_v37, %s1953_s3 }
0x100c   :  { %v586_v38 = vpop.permute.xlu0 %585 }
0x100d   :  { %1672 = vmatmul.msk.bf16.vlgmr.msra.gmra.mxu0 %vm74_vm0, %v586_v38 }
0x108a   :  { %v599_v39 = vpop.f32.mrf.mxu0 }
0x108b   :  { %v604_v40 = vrot.slane %v599_v39, 2 }
0x108d   :  { %v606_v41 = vadd.f32 %v604_v40, %v2090_v4 }
0x108f   :  { %1805 = vtanh.f32 %v606_v41  ;;  %v1673_v44 = vmul.f32 -1.442695, %v606_v41 }
0x1091   :  { %1807 = vpow2.f32 %v1673_v44 }
0x1092   :  { %v601_v42 = vpop.f32.mrf.mxu0 }
0x1095   :  { %v1806_v43 = vpop.eup %1805 }
0x1096   :  { %632 = vrot.lane.b32.xlu1 %v1806_v43, %s1952_s2 }
0x1097   :  { %v1808_v45 = vpop.eup %1807 }
0x1098   :  { %v610_v46 = vadd.f32 1.0, %v1808_v45 }
0x109a   :  { %1809 = vrcp.f32 %v610_v46  ;;  %v622_v51 = vand.u32 2147483648, %v610_v46  ;;  %vm616_vm15 = vweird.f32 %v610_v46  ;;  %v620_v9 = vand.u32 2147483647, %v610_v46 }
0x109c   :  { %v623_v52 = vor.u32 1.1754944e-38, %v622_v51  ;;  %vm621_vm2 = vcmp.eq.f32.partialorder %v620_v9, 8.507059e+37 }
0x109e   :  { %159 = vrot.lane.b32.xlu1 %v2053_v33, %s1953_s3 }
0x10a0   :  { %v1810_v47 = vpop.eup %1809 }
0x10a1   :  { %v612_v4 = vmul.f32 %v1810_v47, %v610_v46  ;;  %vm617_vm14 = vweird.f32 %v1810_v47 }
0x10a2   :  { %vm618_vm1 = vmor %vm616_vm15, %vm617_vm14 }
0x10a3   :  { %v613_v48 = vsub.f32 1.0, %v612_v4 }
0x10a5   :  { %v614_v49 = vmul.f32 %v1810_v47, %v613_v48 }
0x10a6   :  { %371 = vrot.lane.b32.xlu1 %v2083_v63, %s1953_s3 }
0x10a7   :  { %v615_v50 = vadd.f32 %v1810_v47, %v614_v49 }
0x10a9   :  { %v619_v33 = vsel %vm618_vm1, %v1810_v47, %v615_v50 }
0x10aa   :  { %v624_v53 = vsel %vm621_vm2, %v623_v52, %v619_v33 }
0x10ab   :  { %v630_v59 = vmul.f32 %v628_v58, %v624_v53 }
0x10ae   :  { %578 = vrot.lane.b32.xlu1 %v576_v35, %s1953_s3 }
0x1108   :  { %v633_v63 = vpop.permute.xlu1 %632 }
0x1109   :  { %v635_v54 = vmul.f32 %v633_v63, %v624_v53 }
0x110b   :  { %637 = vrot.lane.b32.xlu2 %v635_v54, %s1953_s3 }
0x1110   :  { %v160_v55 = vpop.permute.xlu1 %159 }
0x1111   :  { %163 = vst.msk [vmem:[#allocation2] sm:$0x3] %vm162_vm3, %v160_v55 }
0x1113   :  { %229 = vrot.lane.b32.xlu2 %v2063_v62, %s1953_s3 }
0x1118   :  { %v372_v56 = vpop.permute.xlu1 %371 }
0x1119   :  { %375 = vst.msk [vmem:[#allocation2] sm:$0xc0] %vm374_vm4, %v372_v56 }
0x111b   :  { %439 = vrot.lane.b32.xlu2 %v2096_v32, %s1953_s3  ;;  %v1732_v32 = vld [vmem:[%s2323_s5 + $0x8] sm:$0xff] }
0x111c   :  { %714 = vmatpush.bf16.msra.mxu2 %v1732_v32  ;;  %777 = vmatpush.bf16.msra.mxu3 %v1732_v32 }
0x111d   :  { %847 = vmatpush.bf16.msrb.mxu0 %v1732_v32  ;;  %917 = vmatpush.bf16.msrb.mxu1 %v1732_v32 }
0x1120   :  { %v579_v57 = vpop.permute.xlu1 %578  ;;  %715 = vmatpush.bf16.msra.mxu2 %v1731_v7  ;;  %778 = vmatpush.bf16.msra.mxu3 %v1731_v7 }
0x1121   :  { %581 = vst.msk [vmem:[#allocation2 + $0x8] sm:$0x30] %vm303_vm5, %v579_v57  ;;  %848 = vmatpush.bf16.msrb.mxu0 %v1731_v7  ;;  %918 = vmatpush.bf16.msrb.mxu1 %v1731_v7 }
0x1123   :  { %716 = vmatmul.bf16.vlgmr.msra.gmra.mxu2 %v1951_v3 }
0x1124   :  { %987 = vmatpush.bf16.msrb.mxu2 %v1732_v32  ;;  %1053 = vmatpush.bf16.msrb.mxu3 %v1732_v32 }
0x1125   :  { %1123 = vmatpush.bf16.msra.mxu0 %v1732_v32 }
0x1128   :  { %988 = vmatpush.bf16.msrb.mxu2 %v1731_v7  ;;  %1054 = vmatpush.bf16.msrb.mxu3 %v1731_v7 }
0x1129   :  { %1124 = vmatpush.bf16.msra.mxu0 %v1731_v7 }
0x1165   :  { %v638_v60 = vpop.permute.xlu2 %637 }
0x1166   :  { %v640_v0 = vadd.f32 %v638_v60, %v630_v59 }
0x1168   :  { %1811 = vtanh.f32 %v640_v0 }
0x116d   :  { %v230_v1 = vpop.permute.xlu2 %229 }
0x116e   :  { %v1812_v2 = vpop.eup %1811  ;;  %233 = vst.msk [vmem:[#allocation2] sm:$0xc] %vm232_vm6, %v230_v1 }
0x116f   :  { %643 = vrot.lane.b32.xlu0 %v1812_v2, %s1952_s2 }
0x1175   :  { %v440_v62 = vpop.permute.xlu2 %439 }
0x1176   :  { %442 = vst.msk [vmem:[#allocation2 + $0x8] sm:$0x3] %vm162_vm3, %v440_v62 }
0x1177   :  { %300 = vrot.lane.b32.xlu0 %v2073_v31, %s1953_s3 }
0x117f   :  { %508 = vrot.lane.b32.xlu0 %v2106_v61, %s1953_s3 }
0x11a6   :  { %v717_v15 = vpop.f32.mrf.mxu2 }
0x11ae   :  { %v719_v16 = vpop.f32.mrf.mxu2 }
0x11e1   :  { %v644_v31 = vpop.permute.xlu0 %643 }
0x11e2   :  { %v646_v61 = vmul.f32 %v644_v31, %v624_v53 }
0x11e4   :  { %648 = vrot.lane.b32.xlu2 %v646_v61, %s1953_s3 }
0x11e9   :  { %v301_v8 = vpop.permute.xlu0 %300 }
0x11ea   :  { %304 = vst.msk [vmem:[#allocation2] sm:$0x30] %vm303_vm5, %v301_v8 }
0x11f1   :  { %v509_v10 = vpop.permute.xlu0 %508  ;;  %v652_v12 = vld [vmem:[#allocation2] sm:$0xff] }
0x11f2   :  { %511 = vst.msk [vmem:[#allocation2 + $0x8] sm:$0xc] %vm232_vm6, %v509_v10 }
0x123e   :  { %v649_v3 = vpop.permute.xlu2 %648 }
0x123f   :  { %651 = vst.msk [vmem:[#allocation2 + $0x8] sm:$0xc0] %vm374_vm4, %v649_v3 }
0x1246   :  { %v653_v13 = vld [vmem:[#allocation2 + $0x8] sm:$0xff] }
0x1247   :  { %v654_v14 = vpack.c.bf16 %v653_v13, %v652_v12 }
0x1249   :  { %1682 = vmatmul.msk.bf16.vlgmr.msra.gmra.mxu1 %vm74_vm0, %v654_v14 }
0x124a   :  { %1193 = vmatpush.bf16.msra.mxu1 %v1732_v32 }
0x124e   :  { %1194 = vmatpush.bf16.msra.mxu1 %v1731_v7 }
0x12c6   :  { %v691_v18 = vpop.f32.mrf.mxu1 }
0x12c7   :  { %v2164_v6 = vadd.f32 %v2161_v17, %v691_v18 }
0x12c9   :  { %v721_v19 = vadd.f32 %v717_v15, %v2164_v6 }
0x12cb   :  { %1813 = vtanh.f32 %v721_v19  ;;  %v1691_v21 = vmul.f32 -1.442695, %v721_v19 }
0x12cd   :  { %1815 = vpow2.f32 %v1691_v21 }
0x12d1   :  { %v1814_v20 = vpop.eup %1813 }
0x12d2   :  { %744 = vrot.lane.b32.xlu0 %v1814_v20, %s1952_s2 }
0x12d3   :  { %v1816_v22 = vpop.eup %1815 }
0x12d4   :  { %v725_v23 = vadd.f32 1.0, %v1816_v22 }
0x12d6   :  { %1817 = vrcp.f32 %v725_v23  ;;  %v737_v29 = vand.u32 2147483648, %v725_v23  ;;  %vm731_vm8 = vweird.f32 %v725_v23  ;;  %v735_v30 = vand.u32 2147483647, %v725_v23 }
0x12d8   :  { %v738_v35 = vor.u32 1.1754944e-38, %v737_v29  ;;  %vm736_vm10 = vcmp.eq.f32.partialorder %v735_v30, 8.507059e+37 }
0x12dc   :  { %v1818_v24 = vpop.eup %1817 }
0x12dd   :  { %v727_v25 = vmul.f32 %v1818_v24, %v725_v23  ;;  %vm732_vm7 = vweird.f32 %v1818_v24 }
0x12de   :  { %vm733_vm9 = vmor %vm731_vm8, %vm732_vm7 }
0x12df   :  { %v728_v26 = vsub.f32 1.0, %v727_v25 }
0x12e1   :  { %v729_v27 = vmul.f32 %v1818_v24, %v728_v26 }
0x12e3   :  { %v730_v28 = vadd.f32 %v1818_v24, %v729_v27 }
0x12e5   :  { %v734_v34 = vsel %vm733_vm9, %v1818_v24, %v730_v28 }
0x12e6   :  { %v739_v37 = vsel %vm736_vm10, %v738_v35, %v734_v34 }
0x12e7   :  { %v742_v39 = vmul.f32 0.0, %v739_v37 }
0x1344   :  { %v745_v36 = vpop.permute.xlu0 %744 }
0x1345   :  { %v747_v38 = vmul.f32 %v745_v36, %v739_v37 }
0x1347   :  { %749 = vrot.lane.b32.xlu1 %v747_v38, %s1953_s3 }
0x13b9   :  { %v750_v40 = vpop.permute.xlu1 %749 }
0x13ba   :  { %v752_v41 = vadd.f32 %v750_v40, %v742_v39 }
0x13bc   :  { %1819 = vtanh.f32 %v752_v41  ;;  %v809_v2 = vrot.slane %v752_v41, 6 }
0x13c2   :  { %v1820_v42 = vpop.eup %1819 }
0x13c3   :  { %755 = vrot.lane.b32.xlu2 %v1820_v42, %s1952_s2 }
0x141d   :  { %v756_v43 = vpop.permute.xlu2 %755 }
0x141e   :  { %v2170_v44 = vmul.f32 %v756_v43, %v739_v37 }
0x1420   :  { %v764_v45 = vpack.c.bf16 %v2170_v44, %v2170_v44 }
0x1422   :  { %766 = vrot.lane.b32.xlu0 %v764_v45, %s1953_s3 }
0x1494   :  { %v767_v46 = vpop.permute.xlu0 %766 }
0x1495   :  { %1692 = vmatmul.msk.bf16.vlgmr.msra.gmra.mxu3 %vm74_vm0, %v767_v46  ;;  %v693_v46 = vpop.f32.mrf.mxu1 }
0x1518   :  { %v780_v47 = vpop.f32.mrf.mxu3 }
0x1519   :  { %v785_v4 = vrot.slane %v780_v47, 6 }
0x151b   :  { %v787_v48 = vadd.f32 %v785_v4, %v2164_v6 }
0x151d   :  { %1821 = vtanh.f32 %v787_v48  ;;  %v1693_v51 = vmul.f32 -1.442695, %v787_v48 }
0x151f   :  { %1823 = vpow2.f32 %v1693_v51 }
0x1520   :  { %v782_v49 = vpop.f32.mrf.mxu3 }
0x1523   :  { %v1822_v50 = vpop.eup %1821 }
0x1524   :  { %813 = vrot.lane.b32.xlu1 %v1822_v50, %s1952_s2 }
0x1525   :  { %v1824_v9 = vpop.eup %1823 }
0x1526   :  { %v791_v33 = vadd.f32 1.0, %v1824_v9 }
0x1528   :  { %1825 = vrcp.f32 %v791_v33  ;;  %v803_v56 = vand.u32 2147483648, %v791_v33  ;;  %vm797_vm12 = vweird.f32 %v791_v33  ;;  %v801_v57 = vand.u32 2147483647, %v791_v33 }
0x152a   :  { %v804_v59 = vor.u32 1.1754944e-38, %v803_v56  ;;  %vm802_vm14 = vcmp.eq.f32.partialorder %v801_v57, 8.507059e+37 }
0x152e   :  { %v1826_v52 = vpop.eup %1825 }
0x152f   :  { %v793_v63 = vmul.f32 %v1826_v52, %v791_v33  ;;  %vm798_vm11 = vweird.f32 %v1826_v52 }
0x1530   :  { %vm799_vm13 = vmor %vm797_vm12, %vm798_vm11 }
0x1531   :  { %v794_v53 = vsub.f32 1.0, %v793_v63 }
0x1533   :  { %v795_v54 = vmul.f32 %v1826_v52, %v794_v53 }
0x1535   :  { %v796_v55 = vadd.f32 %v1826_v52, %v795_v54 }
0x1537   :  { %v800_v58 = vsel %vm799_vm13, %v1826_v52, %v796_v55 }
0x1538   :  { %v805_v0 = vsel %vm802_vm14, %v804_v59, %v800_v58 }
0x1539   :  { %v811_v62 = vmul.f32 %v809_v2, %v805_v0 }
0x1596   :  { %v814_v60 = vpop.permute.xlu1 %813 }
0x1597   :  { %v816_v1 = vmul.f32 %v814_v60, %v805_v0 }
0x1599   :  { %818 = vrot.lane.b32.xlu2 %v816_v1, %s1953_s3 }
0x15f3   :  { %v819_v32 = vpop.permute.xlu2 %818 }
0x15f4   :  { %v821_v5 = vadd.f32 %v819_v32, %v811_v62 }
0x15f6   :  { %1827 = vtanh.f32 %v821_v5  ;;  %v879_v35 = vrot.slane %v821_v5, 6 }
0x15fc   :  { %v1828_v7 = vpop.eup %1827 }
0x15fd   :  { %824 = vrot.lane.b32.xlu0 %v1828_v7, %s1952_s2 }
0x166f   :  { %v825_v31 = vpop.permute.xlu0 %824 }
0x1670   :  { %v2180_v61 = vmul.f32 %v825_v31, %v805_v0 }
0x1672   :  { %v833_v8 = vpack.c.bf16 %v2180_v61, %v2180_v61 }
0x1674   :  { %v835_v10 = vrot.slane %v833_v8, 1 }
0x1676   :  { %836 = vrot.lane.b32.xlu1 %v835_v10, %s1953_s3 }
0x16e8   :  { %v837_v11 = vpop.permute.xlu1 %836 }
0x16e9   :  { %1694 = vmatmul.msk.bf16.vlgmr.msrb.gmra.mxu0 %vm74_vm0, %v837_v11 }
0x1766   :  { %v850_v3 = vpop.f32.mrf.mxu0 }
0x1767   :  { %v855_v12 = vrot.slane %v850_v3, 4  ;;  %v2207_v3 = vadd.f32 %v2161_v17, %v693_v46 }
0x1769   :  { %v857_v13 = vadd.f32 %v855_v12, %v2164_v6 }
0x176b   :  { %1829 = vtanh.f32 %v857_v13  ;;  %v1695_v16 = vmul.f32 -1.442695, %v857_v13 }
0x176d   :  { %1831 = vpow2.f32 %v1695_v16 }
0x176e   :  { %v852_v14 = vpop.f32.mrf.mxu0 }
0x1771   :  { %v1830_v15 = vpop.eup %1829 }
0x1772   :  { %883 = vrot.lane.b32.xlu2 %v1830_v15, %s1952_s2 }
0x1773   :  { %v1832_v18 = vpop.eup %1831 }
0x1774   :  { %v861_v19 = vadd.f32 1.0, %v1832_v18 }
0x1776   :  { %1833 = vrcp.f32 %v861_v19  ;;  %v873_v25 = vand.u32 2147483648, %v861_v19  ;;  %vm867_vm1 = vweird.f32 %v861_v19  ;;  %v871_v26 = vand.u32 2147483647, %v861_v19 }
0x1778   :  { %v874_v28 = vor.u32 1.1754944e-38, %v873_v25  ;;  %vm872_vm7 = vcmp.eq.f32.partialorder %v871_v26, 8.507059e+37 }
0x177c   :  { %v1834_v20 = vpop.eup %1833 }
0x177d   :  { %v863_v21 = vmul.f32 %v1834_v20, %v861_v19  ;;  %vm868_vm15 = vweird.f32 %v1834_v20 }
0x177e   :  { %vm869_vm2 = vmor %vm867_vm1, %vm868_vm15 }
0x177f   :  { %v864_v22 = vsub.f32 1.0, %v863_v21 }
0x1781   :  { %v865_v23 = vmul.f32 %v1834_v20, %v864_v22 }
0x1783   :  { %v866_v24 = vadd.f32 %v1834_v20, %v865_v23 }
0x1785   :  { %v870_v27 = vsel %vm869_vm2, %v1834_v20, %v866_v24 }
0x1786   :  { %v875_v30 = vsel %vm872_vm7, %v874_v28, %v870_v27 }
0x1787   :  { %v881_v36 = vmul.f32 %v879_v35, %v875_v30 }
0x17cc   :  { %v884_v29 = vpop.permute.xlu2 %883 }
0x17cd   :  { %v886_v34 = vmul.f32 %v884_v29, %v875_v30 }
0x17cf   :  { %888 = vrot.lane.b32.xlu0 %v886_v34, %s1953_s3 }
0x1841   :  { %v889_v37 = vpop.permute.xlu0 %888 }
0x1842   :  { %v891_v38 = vadd.f32 %v889_v37, %v881_v36 }
0x1844   :  { %1835 = vtanh.f32 %v891_v38  ;;  %v949_v1 = vrot.slane %v891_v38, 6 }
0x184a   :  { %v1836_v39 = vpop.eup %1835 }
0x184b   :  { %894 = vrot.lane.b32.xlu1 %v1836_v39, %s1952_s2 }
0x18bd   :  { %v895_v40 = vpop.permute.xlu1 %894 }
0x18be   :  { %v2190_v41 = vmul.f32 %v895_v40, %v875_v30 }
0x18c0   :  { %v903_v42 = vpack.c.bf16 %v2190_v41, %v2190_v41 }
0x18c2   :  { %v905_v43 = vrot.slane %v903_v42, 2 }
0x18c4   :  { %906 = vrot.lane.b32.xlu2 %v905_v43, %s1953_s3 }
0x191e   :  { %v907_v45 = vpop.permute.xlu2 %906 }
0x191f   :  { %1696 = vmatmul.msk.bf16.vlgmr.msrb.gmra.mxu1 %vm74_vm0, %v907_v45 }
0x199c   :  { %v920_v47 = vpop.f32.mrf.mxu1 }
0x199d   :  { %v925_v4 = vrot.slane %v920_v47, 2 }
0x199f   :  { %v927_v48 = vadd.f32 %v925_v4, %v2164_v6 }
0x19a1   :  { %1837 = vtanh.f32 %v927_v48  ;;  %v1697_v51 = vmul.f32 -1.442695, %v927_v48 }
0x19a3   :  { %1839 = vpow2.f32 %v1697_v51 }
0x19a4   :  { %v922_v49 = vpop.f32.mrf.mxu1 }
0x19a7   :  { %v1838_v50 = vpop.eup %1837 }
0x19a8   :  { %953 = vrot.lane.b32.xlu0 %v1838_v50, %s1952_s2 }
0x19a9   :  { %v1840_v9 = vpop.eup %1839 }
0x19aa   :  { %v931_v33 = vadd.f32 1.0, %v1840_v9 }
0x19ac   :  { %1841 = vrcp.f32 %v931_v33  ;;  %v943_v56 = vand.u32 2147483648, %v931_v33  ;;  %vm937_vm9 = vweird.f32 %v931_v33  ;;  %v941_v57 = vand.u32 2147483647, %v931_v33 }
0x19ae   :  { %v944_v58 = vor.u32 1.1754944e-38, %v943_v56  ;;  %vm942_vm11 = vcmp.eq.f32.partialorder %v941_v57, 8.507059e+37 }
0x19b2   :  { %v1842_v52 = vpop.eup %1841 }
0x19b3   :  { %v933_v63 = vmul.f32 %v1842_v52, %v931_v33  ;;  %vm938_vm8 = vweird.f32 %v1842_v52 }
0x19b4   :  { %vm939_vm10 = vmor %vm937_vm9, %vm938_vm8 }
0x19b5   :  { %v934_v53 = vsub.f32 1.0, %v933_v63 }
0x19b7   :  { %v935_v54 = vmul.f32 %v1842_v52, %v934_v53 }
0x19b9   :  { %v936_v55 = vadd.f32 %v1842_v52, %v935_v54 }
0x19bb   :  { %v940_v6 = vsel %vm939_vm10, %v1842_v52, %v936_v55 }
0x19bc   :  { %v945_v60 = vsel %vm942_vm11, %v944_v58, %v940_v6 }
0x19bd   :  { %v951_v2 = vmul.f32 %v949_v1, %v945_v60 }
0x1a1a   :  { %v954_v59 = vpop.permute.xlu0 %953 }
0x1a1b   :  { %v956_v0 = vmul.f32 %v954_v59, %v945_v60 }
0x1a1d   :  { %958 = vrot.lane.b32.xlu1 %v956_v0, %s1953_s3 }
0x1a8f   :  { %v959_v62 = vpop.permute.xlu1 %958 }
0x1a90   :  { %v961_v32 = vadd.f32 %v959_v62, %v951_v2 }
0x1a92   :  { %1843 = vtanh.f32 %v961_v32  ;;  %v1016_v34 = vrot.slane %v961_v32, 6 }
0x1a98   :  { %v1844_v5 = vpop.eup %1843 }
0x1a99   :  { %964 = vrot.lane.b32.xlu2 %v1844_v5, %s1952_s2 }
0x1af3   :  { %v965_v7 = vpop.permute.xlu2 %964 }
0x1af4   :  { %v2200_v31 = vmul.f32 %v965_v7, %v945_v60 }
0x1af6   :  { %v973_v8 = vpack.c.bf16 %v2200_v31, %v2200_v31 }
0x1af8   :  { %v975_v10 = vrot.slane %v973_v8, 3 }
0x1afa   :  { %976 = vrot.lane.b32.xlu0 %v975_v10, %s1953_s3 }
0x1b6c   :  { %v977_v11 = vpop.permute.xlu0 %976 }
0x1b6d   :  { %1698 = vmatmul.msk.bf16.vlgmr.msrb.gmra.mxu2 %vm74_vm0, %v977_v11 }
0x1bf0   :  { %v990_v12 = vpop.f32.mrf.mxu2 }
0x1bf1   :  { %v994_v13 = vadd.f32 %v990_v12, %v2207_v3 }
0x1bf3   :  { %1845 = vtanh.f32 %v994_v13  ;;  %v1699_v16 = vmul.f32 -1.442695, %v994_v13 }
0x1bf5   :  { %1847 = vpow2.f32 %v1699_v16 }
0x1bf8   :  { %v992_v14 = vpop.f32.mrf.mxu2 }
0x1bf9   :  { %v1846_v15 = vpop.eup %1845 }
0x1bfa   :  { %1020 = vrot.lane.b32.xlu1 %v1846_v15, %s1952_s2 }
0x1bfb   :  { %v1848_v18 = vpop.eup %1847 }
0x1bfc   :  { %v998_v19 = vadd.f32 1.0, %v1848_v18 }
0x1bfe   :  { %1849 = vrcp.f32 %v998_v19  ;;  %v1010_v17 = vand.u32 2147483648, %v998_v19  ;;  %vm1004_vm13 = vweird.f32 %v998_v19  ;;  %v1008_v25 = vand.u32 2147483647, %v998_v19 }
0x1c00   :  { %v1011_v27 = vor.u32 1.1754944e-38, %v1010_v17  ;;  %vm1009_vm15 = vcmp.eq.f32.partialorder %v1008_v25, 8.507059e+37 }
0x1c04   :  { %v1850_v20 = vpop.eup %1849 }
0x1c05   :  { %v1000_v21 = vmul.f32 %v1850_v20, %v998_v19  ;;  %vm1005_vm12 = vweird.f32 %v1850_v20 }
0x1c06   :  { %vm1006_vm14 = vmor %vm1004_vm13, %vm1005_vm12 }
0x1c07   :  { %v1001_v22 = vsub.f32 1.0, %v1000_v21 }
0x1c09   :  { %v1002_v23 = vmul.f32 %v1850_v20, %v1001_v22 }
0x1c0b   :  { %v1003_v24 = vadd.f32 %v1850_v20, %v1002_v23 }
0x1c0d   :  { %v1007_v26 = vsel %vm1006_vm14, %v1850_v20, %v1003_v24 }
0x1c0e   :  { %v1012_v29 = vsel %vm1009_vm15, %v1011_v27, %v1007_v26 }
0x1c0f   :  { %v1018_v35 = vmul.f32 %v1016_v34, %v1012_v29 }
0x1c6c   :  { %v1021_v28 = vpop.permute.xlu1 %1020 }
0x1c6d   :  { %v1023_v30 = vmul.f32 %v1021_v28, %v1012_v29 }
0x1c6f   :  { %1025 = vrot.lane.b32.xlu2 %v1023_v30, %s1953_s3 }
0x1cc9   :  { %v1026_v36 = vpop.permute.xlu2 %1025 }
0x1cca   :  { %v1028_v37 = vadd.f32 %v1026_v36, %v1018_v35 }
0x1ccc   :  { %1851 = vtanh.f32 %v1028_v37  ;;  %v1085_v60 = vrot.slane %v1028_v37, 6 }
0x1cd2   :  { %v1852_v38 = vpop.eup %1851 }
0x1cd3   :  { %1031 = vrot.lane.b32.xlu0 %v1852_v38, %s1952_s2 }
0x1d45   :  { %v1032_v39 = vpop.permute.xlu0 %1031 }
0x1d46   :  { %v2213_v40 = vmul.f32 %v1032_v39, %v1012_v29 }
0x1d48   :  { %v1040_v42 = vpack.c.bf16 %v2213_v40, %v2213_v40 }
0x1d4a   :  { %1042 = vrot.lane.b32.xlu1 %v1040_v42, %s1953_s3 }
0x1dbc   :  { %v1043_v43 = vpop.permute.xlu1 %1042 }
0x1dbd   :  { %1700 = vmatmul.msk.bf16.vlgmr.msrb.gmra.mxu3 %vm74_vm0, %v1043_v43 }
0x1e40   :  { %v1056_v45 = vpop.f32.mrf.mxu3 }
0x1e41   :  { %v1061_v46 = vrot.slane %v1056_v45, 6 }
0x1e43   :  { %v1063_v47 = vadd.f32 %v1061_v46, %v2207_v3 }
0x1e45   :  { %1853 = vtanh.f32 %v1063_v47  ;;  %v1701_v49 = vmul.f32 -1.442695, %v1063_v47 }
0x1e47   :  { %1855 = vpow2.f32 %v1701_v49 }
0x1e48   :  { %v1058_v4 = vpop.f32.mrf.mxu3 }
0x1e4b   :  { %v1854_v48 = vpop.eup %1853 }
0x1e4c   :  { %1089 = vrot.lane.b32.xlu2 %v1854_v48, %s1952_s2 }
0x1e4d   :  { %v1856_v50 = vpop.eup %1855 }
0x1e4e   :  { %v1067_v51 = vadd.f32 1.0, %v1856_v50 }
0x1e50   :  { %1857 = vrcp.f32 %v1067_v51  ;;  %v1079_v54 = vand.u32 2147483648, %v1067_v51  ;;  %vm1073_vm2 = vweird.f32 %v1067_v51  ;;  %v1077_v55 = vand.u32 2147483647, %v1067_v51 }
0x1e52   :  { %v1080_v57 = vor.u32 1.1754944e-38, %v1079_v54  ;;  %vm1078_vm8 = vcmp.eq.f32.partialorder %v1077_v55, 8.507059e+37 }
0x1e56   :  { %v1858_v9 = vpop.eup %1857 }
0x1e57   :  { %v1069_v33 = vmul.f32 %v1858_v9, %v1067_v51  ;;  %vm1074_vm1 = vweird.f32 %v1858_v9 }
0x1e58   :  { %vm1075_vm7 = vmor %vm1073_vm2, %vm1074_vm1 }
0x1e59   :  { %v1070_v52 = vsub.f32 1.0, %v1069_v33 }
0x1e5b   :  { %v1071_v63 = vmul.f32 %v1858_v9, %v1070_v52 }
0x1e5d   :  { %v1072_v53 = vadd.f32 %v1858_v9, %v1071_v63 }
0x1e5f   :  { %v1076_v56 = vsel %vm1075_vm7, %v1858_v9, %v1072_v53 }
0x1e60   :  { %v1081_v58 = vsel %vm1078_vm8, %v1080_v57, %v1076_v56 }
0x1e61   :  { %v1087_v0 = vmul.f32 %v1085_v60, %v1081_v58 }
0x1ea6   :  { %v1090_v6 = vpop.permute.xlu2 %1089 }
0x1ea7   :  { %v1092_v59 = vmul.f32 %v1090_v6, %v1081_v58 }
0x1ea9   :  { %1094 = vrot.lane.b32.xlu0 %v1092_v59, %s1953_s3 }
0x1f1b   :  { %v1095_v1 = vpop.permute.xlu0 %1094 }
0x1f1c   :  { %v1097_v2 = vadd.f32 %v1095_v1, %v1087_v0 }
0x1f1e   :  { %1859 = vtanh.f32 %v1097_v2  ;;  %v1155_v34 = vrot.slane %v1097_v2, 6 }
0x1f24   :  { %v1860_v62 = vpop.eup %1859 }
0x1f25   :  { %1100 = vrot.lane.b32.xlu1 %v1860_v62, %s1952_s2 }
0x1f97   :  { %v1101_v32 = vpop.permute.xlu1 %1100 }
0x1f98   :  { %v2223_v5 = vmul.f32 %v1101_v32, %v1081_v58 }
0x1f9a   :  { %v1109_v7 = vpack.c.bf16 %v2223_v5, %v2223_v5 }
0x1f9c   :  { %v1111_v8 = vrot.slane %v1109_v7, 1 }
0x1f9e   :  { %1112 = vrot.lane.b32.xlu2 %v1111_v8, %s1953_s3 }
0x1ff8   :  { %v1113_v10 = vpop.permute.xlu2 %1112 }
0x1ff9   :  { %1702 = vmatmul.msk.bf16.vlgmr.msra.gmra.mxu0 %vm74_vm0, %v1113_v10 }
0x2076   :  { %v1126_v11 = vpop.f32.mrf.mxu0 }
0x2077   :  { %v1131_v12 = vrot.slane %v1126_v11, 4 }
0x2079   :  { %v1133_v13 = vadd.f32 %v1131_v12, %v2207_v3 }
0x207b   :  { %1861 = vtanh.f32 %v1133_v13  ;;  %v1703_v16 = vmul.f32 -1.442695, %v1133_v13  ;;  %v1734_v13 = vld [vmem:[%s2325_s7 + $0x8] sm:$0xff] }
0x207c   :  { %1281 = vmatpush.bf16.msra.mxu2 %v1734_v13 }
0x207d   :  { %1863 = vpow2.f32 %v1703_v16 }
0x207e   :  { %v1128_v14 = vpop.f32.mrf.mxu0 }
0x2081   :  { %v1862_v15 = vpop.eup %1861 }
0x2082   :  { %1159 = vrot.lane.b32.xlu0 %v1862_v15, %s1952_s2 }
0x2083   :  { %v1864_v18 = vpop.eup %1863 }
0x2084   :  { %v1137_v19 = vadd.f32 1.0, %v1864_v18 }
0x2086   :  { %1865 = vrcp.f32 %v1137_v19  ;;  %v1149_v17 = vand.u32 2147483648, %v1137_v19  ;;  %vm1143_vm10 = vweird.f32 %v1137_v19  ;;  %v1147_v25 = vand.u32 2147483647, %v1137_v19 }
0x2088   :  { %v1150_v27 = vor.u32 1.1754944e-38, %v1149_v17  ;;  %vm1148_vm12 = vcmp.eq.f32.partialorder %v1147_v25, 8.507059e+37 }
0x208c   :  { %v1866_v20 = vpop.eup %1865 }
0x208d   :  { %v1139_v21 = vmul.f32 %v1866_v20, %v1137_v19  ;;  %vm1144_vm9 = vweird.f32 %v1866_v20 }
0x208e   :  { %vm1145_vm11 = vmor %vm1143_vm10, %vm1144_vm9 }
0x208f   :  { %v1140_v22 = vsub.f32 1.0, %v1139_v21 }
0x2091   :  { %v1141_v23 = vmul.f32 %v1866_v20, %v1140_v22  ;;  %v1733_v22 = vld [vmem:[%s2325_s7] sm:$0xff] }
0x2092   :  { %1282 = vmatpush.bf16.msra.mxu2 %v1733_v22 }
0x2093   :  { %v1142_v24 = vadd.f32 %v1866_v20, %v1141_v23 }
0x2095   :  { %v1146_v26 = vsel %vm1145_vm11, %v1866_v20, %v1142_v24 }
0x2096   :  { %v1151_v29 = vsel %vm1148_vm12, %v1150_v27, %v1146_v26  ;;  %v1747_v26 = vld [vmem:[%s2326_s8] ss:$0 sm:$0xff] }
0x2097   :  { %v1157_v35 = vmul.f32 %v1155_v34, %v1151_v29 }
0x20f4   :  { %v1160_v28 = vpop.permute.xlu0 %1159 }
0x20f5   :  { %v1162_v30 = vmul.f32 %v1160_v28, %v1151_v29 }
0x20f7   :  { %1164 = vrot.lane.b32.xlu1 %v1162_v30, %s1953_s3 }
0x2169   :  { %v1165_v36 = vpop.permute.xlu1 %1164 }
0x216a   :  { %v1167_v37 = vadd.f32 %v1165_v36, %v1157_v35 }
0x216c   :  { %1867 = vtanh.f32 %v1167_v37  ;;  %v1225_v62 = vrot.slane %v1167_v37, 6 }
0x2172   :  { %v1868_v38 = vpop.eup %1867 }
0x2173   :  { %1170 = vrot.lane.b32.xlu2 %v1868_v38, %s1952_s2 }
0x21cd   :  { %v1171_v39 = vpop.permute.xlu2 %1170 }
0x21ce   :  { %v2233_v42 = vmul.f32 %v1171_v39, %v1151_v29 }
0x21d0   :  { %v1179_v43 = vpack.c.bf16 %v2233_v42, %v2233_v42 }
0x21d2   :  { %v1181_v45 = vrot.slane %v1179_v43, 2 }
0x21d4   :  { %1182 = vrot.lane.b32.xlu0 %v1181_v45, %s1953_s3 }
0x2246   :  { %v1183_v46 = vpop.permute.xlu0 %1182 }
0x2247   :  { %1704 = vmatmul.msk.bf16.vlgmr.msra.gmra.mxu1 %vm74_vm0, %v1183_v46 }
0x22c4   :  { %v1196_v47 = vpop.f32.mrf.mxu1 }
0x22c5   :  { %v1201_v4 = vrot.slane %v1196_v47, 2 }
0x22c7   :  { %v1203_v48 = vadd.f32 %v1201_v4, %v2207_v3 }
0x22c9   :  { %1869 = vtanh.f32 %v1203_v48  ;;  %v1705_v51 = vmul.f32 -1.442695, %v1203_v48 }
0x22cb   :  { %1871 = vpow2.f32 %v1705_v51 }
0x22cc   :  { %v1198_v49 = vpop.f32.mrf.mxu1 }
0x22cf   :  { %v1870_v50 = vpop.eup %1869 }
0x22d0   :  { %1229 = vrot.lane.b32.xlu1 %v1870_v50, %s1952_s2 }
0x22d1   :  { %v1872_v9 = vpop.eup %1871 }
0x22d2   :  { %v1207_v33 = vadd.f32 1.0, %v1872_v9 }
0x22d4   :  { %1873 = vrcp.f32 %v1207_v33  ;;  %v1219_v55 = vand.u32 2147483648, %v1207_v33  ;;  %vm1213_vm14 = vweird.f32 %v1207_v33  ;;  %v1217_v56 = vand.u32 2147483647, %v1207_v33 }
0x22d6   :  { %v1220_v6 = vor.u32 1.1754944e-38, %v1219_v55  ;;  %vm1218_vm1 = vcmp.eq.f32.partialorder %v1217_v56, 8.507059e+37 }
0x22d8   :  { %760 = vrot.lane.b32.xlu1 %v2170_v44, %s1953_s3 }
0x22da   :  { %v1874_v3 = vpop.eup %1873 }
0x22db   :  { %v1209_v52 = vmul.f32 %v1874_v3, %v1207_v33  ;;  %vm1214_vm13 = vweird.f32 %v1874_v3 }
0x22dc   :  { %vm1215_vm15 = vmor %vm1213_vm14, %vm1214_vm13  ;;  %vm1563_vm14 = vcmask 58368  }
0x22dd   :  { %v1210_v63 = vsub.f32 1.0, %v1209_v52 }
0x22df   :  { %v1211_v53 = vmul.f32 %v1874_v3, %v1210_v63 }
0x22e0   :  { %969 = vrot.lane.b32.xlu1 %v2200_v31, %s1953_s3 }
0x22e1   :  { %v1212_v54 = vadd.f32 %v1874_v3, %v1211_v53 }
0x22e3   :  { %v1216_v57 = vsel %vm1215_vm15, %v1874_v3, %v1212_v54 }
0x22e4   :  { %v1221_v59 = vsel %vm1218_vm1, %v1220_v6, %v1216_v57 }
0x22e5   :  { %v1227_v32 = vmul.f32 %v1225_v62, %v1221_v59 }
0x22e8   :  { %1175 = vrot.lane.b32.xlu1 %v2233_v42, %s1953_s3 }
0x2342   :  { %v1230_v58 = vpop.permute.xlu1 %1229 }
0x2343   :  { %v1232_v60 = vmul.f32 %v1230_v58, %v1221_v59 }
0x2345   :  { %1234 = vrot.lane.b32.xlu2 %v1232_v60, %s1953_s3 }
0x234a   :  { %v761_v0 = vpop.permute.xlu1 %760 }
0x234b   :  { %763 = vst.msk [vmem:[#allocation2] sm:$0x3] %vm162_vm3, %v761_v0 }
0x234d   :  { %829 = vrot.lane.b32.xlu2 %v2180_v61, %s1953_s3 }
0x2352   :  { %v970_v1 = vpop.permute.xlu1 %969 }
0x2353   :  { %972 = vst.msk [vmem:[#allocation2] sm:$0xc0] %vm374_vm4, %v970_v1 }
0x2355   :  { %1036 = vrot.lane.b32.xlu2 %v2213_v40, %s1953_s3 }
0x235a   :  { %v1176_v2 = vpop.permute.xlu1 %1175 }
0x235b   :  { %1178 = vst.msk [vmem:[#allocation2 + $0x8] sm:$0x30] %vm303_vm5, %v1176_v2 }
0x239f   :  { %v1235_v7 = vpop.permute.xlu2 %1234 }
0x23a0   :  { %v1237_v8 = vadd.f32 %v1235_v7, %v1227_v32 }
0x23a2   :  { %1875 = vtanh.f32 %v1237_v8 }
0x23a7   :  { %v830_v10 = vpop.permute.xlu2 %829 }
0x23a8   :  { %v1876_v11 = vpop.eup %1875  ;;  %832 = vst.msk [vmem:[#allocation2] sm:$0xc] %vm232_vm6, %v830_v10 }
0x23a9   :  { %1240 = vrot.lane.b32.xlu0 %v1876_v11, %s1952_s2 }
0x23af   :  { %v1037_v12 = vpop.permute.xlu2 %1036 }
0x23b0   :  { %1039 = vst.msk [vmem:[#allocation2 + $0x8] sm:$0x3] %vm162_vm3, %v1037_v12 }
0x23b1   :  { %899 = vrot.lane.b32.xlu0 %v2190_v41, %s1953_s3 }
0x23b9   :  { %1105 = vrot.lane.b32.xlu0 %v2223_v5, %s1953_s3 }
0x241b   :  { %v1241_v14 = vpop.permute.xlu0 %1240 }
0x241c   :  { %v2265_v15 = vmul.f32 %v1241_v14, %v1221_v59 }
0x241e   :  { %1245 = vrot.lane.b32.xlu2 %v2265_v15, %s1953_s3  ;;  %v1299_v16 = vrot.slane %v2265_v15, 4  ;;  %v1291_v18 = vrot.slane %v2265_v15, 6  ;;  %v1307_v20 = vrot.slane %v2265_v15, 2 }
0x2420   :  { %1300 = vrot.lane.b32.xlu0 %v1299_v16, %s1953_s3  ;;  %1292 = vrot.lane.b32.xlu1 %v1291_v18, %s1953_s3 }
0x2423   :  { %v900_v19 = vpop.permute.xlu0 %899 }
0x2424   :  { %902 = vst.msk [vmem:[#allocation2] sm:$0x30] %vm303_vm5, %v900_v19 }
0x2426   :  { %1308 = vrot.lane.b32.xlu2 %v1307_v20, %s1953_s3 }
0x242b   :  { %v1106_v21 = vpop.permute.xlu0 %1105  ;;  %v1249_v24 = vld [vmem:[#allocation2] sm:$0xff] }
0x242c   :  { %1108 = vst.msk [vmem:[#allocation2 + $0x8] sm:$0xc] %vm232_vm6, %v1106_v21 }
0x2478   :  { %v1246_v23 = vpop.permute.xlu2 %1245 }
0x2479   :  { %1248 = vst.msk [vmem:[#allocation2 + $0x8] sm:$0xc0] %vm374_vm4, %v1246_v23 }
0x2480   :  { %v1250_v17 = vld [vmem:[#allocation2 + $0x8] sm:$0xff]  ;;  %v1309_v29 = vpop.permute.xlu2 %1308 }
0x2481   :  { %v1251_v25 = vpack.c.bf16 %v1250_v17, %v1249_v24 }
0x2483   :  { %1714 = vmatmul.msk.bf16.vlgmr.msra.gmra.mxu2 %vm74_vm0, %v1251_v25 }
0x2492   :  { %v1293_v35 = vpop.permute.xlu1 %1292  ;;  %v1301_v36 = vpop.permute.xlu0 %1300 }
0x2506   :  { %v1284_v27 = vpop.f32.mrf.mxu2 }
0x2507   :  { %v1285_v28 = vadd.f32 %v1747_v26, %v1284_v27 }
0x2509   :  { %1877 = vtanh.f32 %v1285_v28 }
0x250e   :  { %v1286_v30 = vpop.f32.mrf.mxu2 }
0x250f   :  { %v1878_v34 = vpop.eup %1877  ;;  %v1287_v37 = vadd.f32 %v1747_v26, %v1286_v30 }
0x2510   :  { %v1311_v38 = vmul.f32 %v1878_v34, %v1309_v29  ;;  %v1303_v39 = vmul.f32 %v1878_v34, %v1301_v36  ;;  %v1295_v43 = vmul.f32 %v1878_v34, %v1293_v35  ;;  %v1315_v4 = vmul.f32 %v1878_v34, %v1246_v23 }
0x2511   :  { %1879 = vtanh.f32 %v1287_v37 }
0x2512   :  { %v1312_v45 = vsel %vm303_vm5, %v1311_v38, 0.0  ;;  %v1304_v46 = vsel %vm232_vm6, %v1303_v39, 0.0  ;;  %v1296_v47 = vsel %vm162_vm3, %v1295_v43, 0.0  ;;  %v1316_v51 = vsel %vm374_vm4, %v1315_v4, 0.0 }
0x2513   :  { %1313 = vadd.xlane.f32.xlu2 %v1312_v45  ;;  %1305 = vadd.xlane.f32.xlu0 %v1304_v46 }
0x2514   :  { %1297 = vadd.xlane.f32.xlu1 %v1296_v47 }
0x2517   :  { %v1880_v48 = vpop.eup %1879 }
0x2518   :  { %v1319_v49 = vmul.f32 %v1880_v48, %v1293_v35  ;;  %v1323_v50 = vmul.f32 %v1880_v48, %v1301_v36  ;;  %v1327_v3 = vmul.f32 %v1880_v48, %v1309_v29  ;;  %v1331_v52 = vmul.f32 %v1880_v48, %v1246_v23 }
0x251a   :  { %v1320_v9 = vsel %vm162_vm3, %v1319_v49, 0.0  ;;  %v1324_v33 = vsel %vm232_vm6, %v1323_v50, 0.0  ;;  %v1328_v63 = vsel %vm303_vm5, %v1327_v3, 0.0  ;;  %v1332_v53 = vsel %vm374_vm4, %v1331_v52, 0.0 }
0x251b   :  { %1317 = vadd.xlane.f32.xlu2 %v1316_v51  ;;  %1321 = vadd.xlane.f32.xlu0 %v1320_v9 }
0x251c   :  { %1325 = vadd.xlane.f32.xlu1 %v1324_v33 }
0x2523   :  { %1329 = vadd.xlane.f32.xlu2 %v1328_v63  ;;  %1333 = vadd.xlane.f32.xlu0 %v1332_v53 }
0x2586   :  { %v1314_v54 = vpop.xlane.xlu2 %1313  ;;  %v1306_v55 = vpop.xlane.xlu0 %1305 }
0x2587   :  { %v1336_v56 = vrot.slane %v1306_v55, 2  ;;  %v1298_v57 = vpop.xlane.xlu1 %1297  ;;  %v1340_v58 = vrot.slane %v1314_v54, 4 }
0x2589   :  { %v1338_v6 = vmax.f32 %v1298_v57, %v1336_v56 }
0x258b   :  { %v1342_v0 = vmax.f32 %v1338_v6, %v1340_v58 }
0x258e   :  { %v1318_v59 = vpop.xlane.xlu2 %1317  ;;  %v1322_v60 = vpop.xlane.xlu0 %1321 }
0x258f   :  { %v1344_v1 = vrot.slane %v1318_v59, 6  ;;  %v1326_v62 = vpop.xlane.xlu1 %1325 }
0x2590   :  { %v1349_v7 = vrot.slane %v1326_v62, 2 }
0x2591   :  { %v1346_v2 = vmax.f32 %v1342_v0, %v1344_v1 }
0x2593   :  { %v1347_v32 = vmax.f32 %v1346_v2, %v1322_v60 }
0x2595   :  { %v1351_v11 = vmax.f32 %v1347_v32, %v1349_v7 }
0x2596   :  { %v1330_v8 = vpop.xlane.xlu2 %1329  ;;  %v1334_v10 = vpop.xlane.xlu0 %1333 }
0x2597   :  { %v1353_v12 = vrot.slane %v1330_v8, 4  ;;  %v1357_v14 = vrot.slane %v1334_v10, 6 }
0x2599   :  { %v1355_v13 = vmax.f32 %v1351_v11, %v1353_v12 }
0x259b   :  { %v1359_v16 = vmax.f32 %v1355_v13, %v1357_v14 }
0x259d   :  { %v1364_v18 = vrot.slane %v1359_v16, 6  ;;  %v1369_v19 = vrot.slane %v1359_v16, 4  ;;  %v1374_v20 = vrot.slane %v1359_v16, 2  ;;  %v1360_v21 = vsub.f32 %v1298_v57, %v1359_v16 }
0x259e   :  { %v1379_v29 = vsub.f32 %v1322_v60, %v1359_v16 }
0x259f   :  { %v1366_v22 = vsub.f32 %v1306_v55, %v1364_v18  ;;  %v1371_v23 = vsub.f32 %v1314_v54, %v1369_v19  ;;  %v1376_v24 = vsub.f32 %v1318_v59, %v1374_v20  ;;  %v1361_v17 = vmul.f32 1.442695, %v1360_v21 }
0x25a0   :  { %v1382_v28 = vsub.f32 %v1326_v62, %v1364_v18  ;;  %v1385_v30 = vsub.f32 %v1330_v8, %v1369_v19  ;;  %v1388_v35 = vsub.f32 %v1334_v10, %v1374_v20  ;;  %v1380_v36 = vmul.f32 1.442695, %v1379_v29  ;;  %v1735_v29 = vld [vmem:[%s2327_s9] sm:$0xff] }
0x25a1   :  { %v1367_v25 = vmul.f32 1.442695, %v1366_v22  ;;  %v1372_v26 = vmul.f32 1.442695, %v1371_v23  ;;  %v1377_v27 = vmul.f32 1.442695, %v1376_v24  ;;  %1881 = vpow2.f32 %v1361_v17 }
0x25a2   :  { %v1383_v34 = vmul.f32 1.442695, %v1382_v28  ;;  %v1386_v37 = vmul.f32 1.442695, %v1385_v30  ;;  %v1389_v43 = vmul.f32 1.442695, %v1388_v35  ;;  %v1519_v23 = vlaneseq }
0x25a3   :  { %1883 = vpow2.f32 %v1367_v25 }
0x25a4   :  { %1885 = vpow2.f32 %v1372_v26  ;;  %v1520_v24 = vand.u32 127, %v1519_v23  ;;  %v1736_v26 = vld [vmem:[%s2327_s9 + $0x8] sm:$0xff]  ;;  %s1954_s9 = smov [#allocation5]  }
0x25a5   :  { %1887 = vpow2.f32 %v1377_v27  ;;  %1598 = vmatpush.bf16.msra.mxu3 %v1736_v26  ;;  %s1622_s28 = sshll.u32 %s1954_s9, 4  ;;  %s1623_s28 = int_to_ptr.vmem [resolvable:$true] %s1622_s28 }
0x25a6   :  { %1889 = vpow2.f32 %v1383_v34  ;;  %vm1524_vm2 = vcmp.eq.s32.totalorder %v1520_v24, 1  ;;  %vm1521_vm7 = vcmp.eq.s32.totalorder %v1520_v24, 0  ;;  %vm1530_vm8 = vcmp.eq.s32.totalorder %v1520_v24, 2 }
0x25a7   :  { %v1882_v38 = vpop.eup %1881  ;;  %1891 = vpow2.f32 %v1380_v36  ;;  %vm1536_vm9 = vcmp.eq.s32.totalorder %v1520_v24, 3  ;;  %vm1545_vm10 = vcmp.eq.s32.totalorder %v1520_v24, 5  ;;  %vm1542_vm11 = vcmp.eq.s32.totalorder %v1520_v24, 4 }
0x25a8   :  { %1893 = vpow2.f32 %v1386_v37  ;;  %vm1551_vm12 = vcmp.eq.s32.totalorder %v1520_v24, 6  ;;  %vm1557_vm13 = vcmp.eq.s32.totalorder %v1520_v24, 7 }
0x25a9   :  { %v1884_v39 = vpop.eup %1883  ;;  %1895 = vpow2.f32 %v1389_v43  ;;  %1599 = vmatpush.bf16.msra.mxu3 %v1735_v29 }
0x25aa   :  { %v1886_v45 = vpop.eup %1885  ;;  %v1392_v46 = vrot.slane %v1884_v39, 2 }
0x25ab   :  { %v1888_v47 = vpop.eup %1887  ;;  %v1396_v48 = vrot.slane %v1886_v45, 4 }
0x25ac   :  { %v1394_v4 = vadd.f32 %v1882_v38, %v1392_v46  ;;  %v1400_v49 = vrot.slane %v1888_v47, 6  ;;  %v1890_v51 = vpop.eup %1889 }
0x25ad   :  { %v1892_v9 = vpop.eup %1891  ;;  %v1405_v52 = vrot.slane %v1890_v51, 2 }
0x25ae   :  { %v1398_v50 = vadd.f32 %v1396_v48, %v1394_v4  ;;  %v1894_v3 = vpop.eup %1893 }
0x25af   :  { %v1896_v53 = vpop.eup %1895  ;;  %v1409_v54 = vrot.slane %v1894_v3, 4 }
0x25b0   :  { %v1402_v33 = vadd.f32 %v1400_v49, %v1398_v50  ;;  %v1413_v56 = vrot.slane %v1896_v53, 6 }
0x25b2   :  { %v1403_v63 = vadd.f32 %v1892_v9, %v1402_v33 }
0x25b4   :  { %v1407_v55 = vadd.f32 %v1405_v52, %v1403_v63 }
0x25b6   :  { %v1411_v57 = vadd.f32 %v1409_v54, %v1407_v55 }
0x25b8   :  { %v1415_v6 = vadd.f32 %v1413_v56, %v1411_v57 }
0x25ba   :  { %1897 = vrcp.f32 %v1415_v6  ;;  %v1427_v0 = vand.u32 2147483648, %v1415_v6  ;;  %v1425_v2 = vand.u32 2147483647, %v1415_v6  ;;  %vm1421_vm4 = vweird.f32 %v1415_v6 }
0x25bc   :  { %v1428_v32 = vor.u32 1.1754944e-38, %v1427_v0  ;;  %vm1426_vm6 = vcmp.eq.f32.partialorder %v1425_v2, 8.507059e+37 }
0x25c0   :  { %v1898_v58 = vpop.eup %1897 }
0x25c1   :  { %v1417_v59 = vmul.f32 %v1898_v58, %v1415_v6  ;;  %vm1422_vm3 = vweird.f32 %v1898_v58 }
0x25c2   :  { %vm1423_vm5 = vmor %vm1421_vm4, %vm1422_vm3 }
0x25c3   :  { %v1418_v60 = vsub.f32 1.0, %v1417_v59 }
0x25c5   :  { %v1419_v1 = vmul.f32 %v1898_v58, %v1418_v60 }
0x25c7   :  { %v1420_v62 = vadd.f32 %v1898_v58, %v1419_v1 }
0x25c9   :  { %v1424_v7 = vsel %vm1423_vm5, %v1898_v58, %v1420_v62 }
0x25ca   :  { %v1429_v8 = vsel %vm1426_vm6, %v1428_v32, %v1424_v7 }
0x25cb   :  { %v1431_v10 = vmul.f32 %v1882_v38, %v1429_v8  ;;  %v1436_v11 = vrot.slane %v1429_v8, 4  ;;  %v1433_v12 = vrot.slane %v1429_v8, 6  ;;  %v1439_v16 = vrot.slane %v1429_v8, 2 }
0x25cc   :  { %v1442_v18 = vmul.f32 %v1892_v9, %v1429_v8 }
0x25cd   :  { %1448 = vperm.xlu2 %1742, %v1431_v10   ;;  %v1438_v13 = vmul.f32 %v1886_v45, %v1436_v11  ;;  %v1435_v14 = vmul.f32 %v1884_v39, %v1433_v12  ;;  %v1441_v19 = vmul.f32 %v1888_v47, %v1439_v16  ;;  %v1444_v20 = vmul.f32 %v1894_v3, %v1436_v11 }
0x25ce   :  { %v1443_v21 = vmul.f32 %v1890_v51, %v1433_v12  ;;  %v1445_v22 = vmul.f32 %v1896_v53, %v1439_v16 }
0x25cf   :  { %1464 = vperm.xlu0 %1744, %v1438_v13   ;;  %1454 = vperm.xlu1 %1743, %v1435_v14  }
0x25d5   :  { %1484 = vperm.xlu2 %1742, %v1442_v18  }
0x25d7   :  { %1474 = vperm.xlu1 %1743, %v1441_v19  }
0x25dd   :  { %1501 = vperm.xlu2 %1742, %v1444_v20  }
0x25df   :  { %1491 = vperm.xlu1 %1743, %v1443_v21  }
0x25e7   :  { %1511 = vperm.xlu1 %1743, %v1445_v22  }
0x2627   :  { %v1449_v17 = vpop.permute.xlu2 %1448 }
0x2628   :  { %v1451_v36 = vmul.f32 %v1449_v17, %v2170_v44  ;;  %v1522_v37 = vsel %vm1521_vm7, %v1449_v17, 0.0 }
0x262f   :  { %v1485_v38 = vpop.permute.xlu2 %1484 }
0x2630   :  { %v1487_v54 = vmul.f32 %v1485_v38, %v2213_v40  ;;  %v1543_v55 = vsel %vm1542_vm11, %v1485_v38, 0.0 }
0x2637   :  { %v1502_v53 = vpop.permute.xlu2 %1501 }
0x2638   :  { %v1504_v6 = vmul.f32 %v1502_v53, %v2233_v42  ;;  %v1552_v58 = vsel %vm1551_vm12, %v1502_v53, 0.0 }
0x2639   :  { %v1554_v1 = vrot.slane %v1552_v58, 4 }
0x263a   :  { %v1506_v62 = vrot.slane %v1504_v6, 4 }
0x2641   :  { %v1455_v25 = vpop.permute.xlu1 %1454  ;;  %v1465_v30 = vpop.permute.xlu0 %1464 }
0x2642   :  { %v1457_v27 = vmul.f32 %v1455_v25, %v2180_v61  ;;  %v1525_v28 = vsel %vm1524_vm2, %v1455_v25, 0.0  ;;  %v1467_v61 = vmul.f32 %v1465_v30, %v2190_v41  ;;  %v1531_v43 = vsel %vm1530_vm8, %v1465_v30, 0.0 }
0x2643   :  { %v1527_v34 = vrot.slane %v1525_v28, 2  ;;  %v1533_v48 = vrot.slane %v1531_v43, 4 }
0x2644   :  { %v1459_v35 = vrot.slane %v1457_v27, 2  ;;  %v1469_v50 = vrot.slane %v1467_v61, 4 }
0x2645   :  { %v1529_v47 = vadd.f32 %v1527_v34, %v1522_v37 }
0x2646   :  { %v1461_v4 = vadd.f32 %v1459_v35, %v1451_v36 }
0x2647   :  { %v1535_v9 = vadd.f32 %v1533_v48, %v1529_v47 }
0x2648   :  { %v1471_v33 = vadd.f32 %v1469_v50, %v1461_v4 }
0x2649   :  { %v1475_v39 = vpop.permute.xlu1 %1474 }
0x264a   :  { %v1477_v45 = vmul.f32 %v1475_v39, %v2200_v31  ;;  %v1537_v46 = vsel %vm1536_vm9, %v1475_v39, 0.0 }
0x264b   :  { %v1539_v49 = vrot.slane %v1537_v46, 6 }
0x264c   :  { %v1479_v51 = vrot.slane %v1477_v45, 6 }
0x264d   :  { %v1541_v44 = vadd.f32 %v1539_v49, %v1535_v9 }
0x264e   :  { %v1481_v52 = vadd.f32 %v1479_v51, %v1471_v33 }
0x264f   :  { %v1544_v57 = vadd.f32 %v1543_v55, %v1541_v44 }
0x2650   :  { %v1488_v59 = vadd.f32 %v1487_v54, %v1481_v52 }
0x2651   :  { %v1492_v3 = vpop.permute.xlu1 %1491 }
0x2652   :  { %v1494_v63 = vmul.f32 %v1492_v3, %v2223_v5  ;;  %v1546_v41 = vsel %vm1545_vm10, %v1492_v3, 0.0 }
0x2653   :  { %v1548_v31 = vrot.slane %v1546_v41, 2 }
0x2654   :  { %v1496_v56 = vrot.slane %v1494_v63, 2 }
0x2655   :  { %v1550_v60 = vadd.f32 %v1548_v31, %v1544_v57 }
0x2656   :  { %v1498_v0 = vadd.f32 %v1496_v56, %v1488_v59 }
0x2657   :  { %v1556_v7 = vadd.f32 %v1554_v1, %v1550_v60 }
0x2658   :  { %v1508_v10 = vadd.f32 %v1506_v62, %v1498_v0 }
0x2659   :  { %v1512_v2 = vpop.permute.xlu1 %1511 }
0x265a   :  { %v1514_v5 = vmul.f32 %v1512_v2, %v2265_v15  ;;  %v1558_v32 = vsel %vm1557_vm13, %v1512_v2, 0.0  ;;  %v1748_v15 = vld [vmem:[%s2328_s10] ss:$0 sm:$0xff] }
0x265b   :  { %v1560_v8 = vrot.slane %v1558_v32, 6 }
0x265c   :  { %v1516_v40 = vrot.slane %v1514_v5, 6 }
0x265d   :  { %v1562_v11 = vadd.f32 %v1560_v8, %v1556_v7 }
0x265e   :  { %v1518_v12 = vadd.f32 %v1516_v40, %v1508_v10 }
0x265f   :  { %1564 = vst.msk [vmem:[#allocation5] sm:$0x3] %vm1563_vm14, %v1562_v11 }
0x2660   :  { %v1565_v42 = vpack.c.bf16 %v1518_v12, %v1518_v12  ;;  %1627 = dma.vmem_to_hbm [thread:$0]  %s1623_s28, 32, %s1625_s0, [#allocation6]  }
0x2662   :  { %1575 = vrot.lane.b32.xlu2 %v1565_v42, %s1953_s3 }
0x26bc   :  { %v1576_v13 = vpop.permute.xlu2 %1575 }
0x26bd   :  { %1723 = vmatmul.msk.bf16.vlgmr.msra.gmra.mxu3 %vm74_vm0, %v1576_v13 }
0x2740   :  { %v1601_v14 = vpop.f32.mrf.mxu3 }
0x2741   :  { %v1602_v16 = vadd.f32 %v1748_v15, %v1601_v14 }
0x2743   :  { %1605 = vst [vmem:[#allocation3] sm:$0x3] %v1602_v16 }
0x2744   :  { %1616 = dma.vmem_to_hbm [thread:$0]  %s1612_s14, 32, %s1614_s16, [#allocation4]  }
0x2748   :  { %v1603_v18 = vpop.f32.mrf.mxu3 }
0x2749   :  { %1947 = dma.done.wait [#allocation4], 32  }
0x274a   :  { %1948 = vsyncadd [#allocation4], 4294967264 }
0x274b   :  { %1949 = dma.done.wait [#allocation6], 32  }
0x274c   :  { %1950 = vsyncadd [#allocation6], 4294967264 }
0x274d   :  { %1636 = vsyncpa [#allocation4], 1 }
0x274e   :  { %1637 = vsyncpa [#allocation6], 1 }

</bundles_post_ra>
